<compile_context>
chip_gen: v5e
topology: v5e:2x2
jax: 0.10.0
libtpu: 0.0.40
codegen_flags: <defaults>
</compile_context>

<pallas_src>
import functools

import jax
import jax.numpy as jnp
from jax import lax
from jax.experimental import pallas as pl
from jax.experimental.pallas import tpu as pltpu


def lstm_kernel(x_ref,                     # (T*B, F_pad)  time-major, batch/feature padded
                w_ref,                     # (rows, L)     packed weight/bias slab (f32)
                out_ref,                   # (B, N_pad)
                *, T, B, H, NP,
                o_w0x, n_w0x, o_w0h, o_wih1, o_whh1, o_wfc, o_bias):
    H4 = 4 * H
    f32 = jnp.float32
    bf16 = jnp.bfloat16

    # ---- load every weight/bias exactly once; cast matmul operands to bf16 ----
    w0x = w_ref[o_w0x:o_w0x + n_w0x, :H4].astype(bf16)    # (F_pad, 4H)
    w0h = w_ref[o_w0h:o_w0h + H, :H4].astype(bf16)        # (H, 4H)
    wih1 = w_ref[o_wih1:o_wih1 + H, :H4].astype(bf16)     # (H, 4H)
    whh1 = w_ref[o_whh1:o_whh1 + H, :H4].astype(bf16)     # (H, 4H)
    wfc = w_ref[o_wfc:o_wfc + H, :NP].astype(bf16)        # (H, N_pad)
    b0 = w_ref[o_bias + 0:o_bias + 1, :H4]                # (1, 4H)  f32 (g-cols x2)
    b1 = w_ref[o_bias + 1:o_bias + 2, :H4]                # (1, 4H)  f32 (g-cols x2)
    bfc = w_ref[o_bias + 2:o_bias + 3, :NP]               # (1, N_pad) f32

    # ---- layer-0 input projection for ALL timesteps: one big MXU call ----
    xp = jnp.dot(x_ref[...].astype(bf16), w0x,
                 preferred_element_type=f32) + b0          # (T*B, 4H) f32

    h0 = jnp.zeros((B, H), f32)
    c0 = jnp.zeros((B, H), f32)
    h1 = jnp.zeros((B, H), f32)
    c1 = jnp.zeros((B, H), f32)
    # h1 starts at zero, so layer-1's recurrent term for step 0 is just the bias.
    p1 = jnp.zeros((B, H4), f32) + b1

    def cell(gates, c):
        # ONE full-width EUP pass over the (B, 4H) gate tile.  The g-gate columns of
        # the weights/bias were pre-scaled by 2, so tanh(g_raw) = 2*sigmoid(gates_g)-1.
        sig = jax.nn.sigmoid(gates)
        i = sig[:, 0 * H:1 * H]
        f = sig[:, 1 * H:2 * H]
        g = 2.0 * sig[:, 2 * H:3 * H] - 1.0                # = tanh(raw g-gate)
        o = sig[:, 3 * H:4 * H]
        c_new = f * c + i * g
        h_new = o * (2.0 * jax.nn.sigmoid(2.0 * c_new) - 1.0)   # = o * tanh(c_new)
        return h_new, c_new

    # ---- fused, fully-unrolled recurrence over time ----
    for t in range(T):
        # layer 0: only the recurrent matmul is on the per-step critical path
        h0b = h0.astype(bf16)
        g0 = xp[t * B:(t + 1) * B, :] + jnp.dot(h0b, w0h,
                                                preferred_element_type=f32)
        h0, c0 = cell(g0, c0)

        # layer 1: h1@W_hh1 was precomputed (p1) -> only one dot on the critical path
        g1 = jnp.dot(h0.astype(bf16), wih1, preferred_element_type=f32) + p1
        h1, c1 = cell(g1, c1)

        # precompute next step's layer-1 recurrent term off the h0 critical chain
        if t + 1 < T:
            p1 = jnp.dot(h1.astype(bf16), whh1, preferred_element_type=f32) + b1

    # ---- fc on the last top-layer hidden state; lane-dense (B, N_pad) write ----
    out_ref[...] = jnp.dot(h1.astype(bf16), wfc,
                           preferred_element_type=f32) + bfc


def lstm_forward(x, params, hidden_size, forecast_horizon):
    """x: (B, T, F) float32 (batch_first, like the PyTorch module)."""
    B, T, F = x.shape
    H = hidden_size
    (w_ih0, w_hh0, b_ih0, b_hh0,
     w_ih1, w_hh1, b_ih1, b_hh1,
     w_fc, b_fc) = params

    # sublane-pad batch/features to multiples of 8, lane-pad fc output to 128
    B_pad = ((B + 7) // 8) * 8
    F_pad = ((F + 7) // 8) * 8
    N_pad = ((forecast_horizon + 127) // 128) * 128
    H4 = 4 * H
    L = max(H4, N_pad)                      # slab lane width (128 here)

    # time-major, batch/feature-padded, flattened input (host-side glue)
    x_tm = jnp.transpose(x, (1, 0, 2)).astype(jnp.float32)            # (T, B, F)
    x_tm = jnp.pad(x_tm, ((0, 0), (0, B_pad - B), (0, F_pad - F)))    # (T, Bp, Fp)
    x_flat = x_tm.reshape(T * B_pad, F_pad)                           # (T*Bp, Fp)

    # g-gate columns scaled by 2 so tanh can be derived from the single sigmoid pass
    gscale = jnp.ones((H4,), jnp.float32).at[2 * H:3 * H].set(2.0)

    def prep_layer(w_ih, w_hh, b_ih, b_hh):
        wx = w_ih.T.astype(jnp.float32) * gscale           # (in, 4H)
        wh = w_hh.T.astype(jnp.float32) * gscale           # (H, 4H)
        b = (b_ih + b_hh).astype(jnp.float32) * gscale     # (4H,)
        return wx, wh, b

    w0x, w0h, b0 = prep_layer(w_ih0, w_hh0, b_ih0, b_hh0)
    w1x, w1h, b1 = prep_layer(w_ih1, w_hh1, b_ih1, b_hh1)
    wfc = w_fc.T.astype(jnp.float32)                        # (H, horizon)
    bfc = b_fc.astype(jnp.float32)                          # (horizon,)

    # pack all weights/biases into ONE lane-aligned f32 slab (2 kernel inputs total)
    o_w0x = 0
    o_w0h = o_w0x + F_pad
    o_wih1 = o_w0h + H
    o_whh1 = o_wih1 + H
    o_wfc = o_whh1 + H
    o_bias = o_wfc + H
    rows = ((o_bias + 3 + 7) // 8) * 8

    slab = jnp.zeros((rows, L), jnp.float32)
    slab = slab.at[o_w0x:o_w0x + F, :H4].set(w0x)
    slab = slab.at[o_w0h:o_w0h + H, :H4].set(w0h)
    slab = slab.at[o_wih1:o_wih1 + H, :H4].set(w1x)
    slab = slab.at[o_whh1:o_whh1 + H, :H4].set(w1h)
    slab = slab.at[o_wfc:o_wfc + H, :forecast_horizon].set(wfc)
    slab = slab.at[o_bias + 0, :H4].set(b0)
    slab = slab.at[o_bias + 1, :H4].set(b1)
    slab = slab.at[o_bias + 2, :forecast_horizon].set(bfc)

    vmem = pl.BlockSpec(memory_space=pltpu.MemorySpace.VMEM)
    out_pad = pl.pallas_call(
        functools.partial(lstm_kernel, T=T, B=B_pad, H=H, NP=N_pad,
                          o_w0x=o_w0x, n_w0x=F_pad, o_w0h=o_w0h,
                          o_wih1=o_wih1, o_whh1=o_whh1,
                          o_wfc=o_wfc, o_bias=o_bias),
        out_shape=jax.ShapeDtypeStruct((B_pad, N_pad), jnp.float32),
        in_specs=[vmem, vmem],
        out_specs=vmem,
    )(x_flat, slab)

    # drop the batch/lane padding outside the kernel
    return out_pad[:B, :forecast_horizon]


def init_params(key, num_features, hidden_size, forecast_horizon):
    """Deterministic uniform(-1/sqrt(H), 1/sqrt(H)) init (PyTorch default)."""
    H, F = hidden_size, num_features
    bound = 1.0 / jnp.sqrt(jnp.float32(H))
    ks = jax.random.split(key, 10)
    u = lambda k, shape: jax.random.uniform(k, shape, jnp.float32, -bound, bound)
    return (
        u(ks[0], (4 * H, F)),   # W_ih layer 0
        u(ks[1], (4 * H, H)),   # W_hh layer 0
        u(ks[2], (4 * H,)),     # b_ih layer 0
        u(ks[3], (4 * H,)),     # b_hh layer 0
        u(ks[4], (4 * H, H)),   # W_ih layer 1
        u(ks[5], (4 * H, H)),   # W_hh layer 1
        u(ks[6], (4 * H,)),     # b_ih layer 1
        u(ks[7], (4 * H,)),     # b_hh layer 1
        u(ks[8], (forecast_horizon, H)),   # fc weight
        u(ks[9], (forecast_horizon,)),     # fc bias
    )


def lstm_reference(x, params, hidden_size, forecast_horizon):
    """Pure-JAX f32 reference matching PyTorch nn.LSTM + nn.Linear semantics."""
    (w_ih0, w_hh0, b_ih0, b_hh0,
     w_ih1, w_hh1, b_ih1, b_hh1,
     w_fc, b_fc) = params
    B, T, _ = x.shape
    H = hidden_size

    def run_layer(seq, w_ih, w_hh, b_ih, b_hh):
        def step(carry, x_t):
            h, c = carry
            g = x_t @ w_ih.T + h @ w_hh.T + b_ih + b_hh
            i = jax.nn.sigmoid(g[:, 0 * H:1 * H])
            f = jax.nn.sigmoid(g[:, 1 * H:2 * H])
            gg = jnp.tanh(g[:, 2 * H:3 * H])
            o = jax.nn.sigmoid(g[:, 3 * H:4 * H])
            c = f * c + i * gg
            h = o * jnp.tanh(c)
            return (h, c), h
        init = (jnp.zeros((B, H), jnp.float32), jnp.zeros((B, H), jnp.float32))
        _, hs = lax.scan(step, init, jnp.transpose(seq, (1, 0, 2)))
        return jnp.transpose(hs, (1, 0, 2))

    h1 = run_layer(x, w_ih0, w_hh0, b_ih0, b_hh0)
    h2 = run_layer(h1, w_ih1, w_hh1, b_ih1, b_hh1)
    return h2[:, -1, :] @ w_fc.T + b_fc


if __name__ == "__main__":
    # Small shapes implied by the module: batch=4, seq=8, num_features=4,
    # hidden_size=32, num_layers=2, forecast_horizon=1.
    B, T, F, H, HORIZON = 4, 8, 4, 32, 1

    key = jax.random.PRNGKey(0)
    k_x, k_p = jax.random.split(key)
    x = jax.random.normal(k_x, (B, T, F), jnp.float32)
    params = init_params(k_p, F, H, HORIZON)

    fwd = jax.jit(functools.partial(lstm_forward,
                                    hidden_size=H, forecast_horizon=HORIZON))
    out = jax.block_until_ready(fwd(x, params))

    ref = lstm_reference(x, params, H, HORIZON)
    assert out.shape == (B, HORIZON)
    # bf16 MXU operands (f32 accumulate) -> loosened tolerance vs the f32 reference
    assert jnp.allclose(out, ref, atol=2e-2, rtol=2e-2), "mismatch vs JAX reference"

    print("KERNEL_OK")
</pallas_src>

<mosaic_0001>
module attributes {stable_mosaic.version = 11 : i64} {
  func.func @lstm_kernel(%arg0: memref<64x8xf32, #tpu.memory_space<vmem>>, %arg1: memref<144x128xf32, #tpu.memory_space<vmem>>, %arg2: memref<8x128xf32, #tpu.memory_space<vmem>>) attributes {dimension_semantics = [], scalar_prefetch = 0 : i64, scratch_operands = 0 : i64, tpu.core_type = #tpu.core_type<tc>} {
    %c0 = arith.constant 0 : index
    %c0_0 = arith.constant 0 : index
    %0 = vector.load %arg1[%c0, %c0_0] : memref<144x128xf32, #tpu.memory_space<vmem>>, vector<8x128xf32>
    %1 = arith.truncf %0 : vector<8x128xf32> to vector<8x128xbf16>
    %c8 = arith.constant 8 : index
    %c0_1 = arith.constant 0 : index
    %2 = vector.load %arg1[%c8, %c0_1] : memref<144x128xf32, #tpu.memory_space<vmem>>, vector<32x128xf32>
    %3 = arith.truncf %2 : vector<32x128xf32> to vector<32x128xbf16>
    %c40 = arith.constant 40 : index
    %c0_2 = arith.constant 0 : index
    %4 = vector.load %arg1[%c40, %c0_2] : memref<144x128xf32, #tpu.memory_space<vmem>>, vector<32x128xf32>
    %5 = arith.truncf %4 : vector<32x128xf32> to vector<32x128xbf16>
    %c72 = arith.constant 72 : index
    %c0_3 = arith.constant 0 : index
    %6 = vector.load %arg1[%c72, %c0_3] : memref<144x128xf32, #tpu.memory_space<vmem>>, vector<32x128xf32>
    %7 = arith.truncf %6 : vector<32x128xf32> to vector<32x128xbf16>
    %c104 = arith.constant 104 : index
    %c0_4 = arith.constant 0 : index
    %8 = vector.load %arg1[%c104, %c0_4] : memref<144x128xf32, #tpu.memory_space<vmem>>, vector<32x128xf32>
    %9 = arith.truncf %8 : vector<32x128xf32> to vector<32x128xbf16>
    %c136 = arith.constant 136 : index
    %c0_5 = arith.constant 0 : index
    %10 = vector.load %arg1[%c136, %c0_5] : memref<144x128xf32, #tpu.memory_space<vmem>>, vector<1x128xf32>
    %c137 = arith.constant 137 : index
    %c0_6 = arith.constant 0 : index
    %11 = vector.load %arg1[%c137, %c0_6] : memref<144x128xf32, #tpu.memory_space<vmem>>, vector<1x128xf32>
    %c138 = arith.constant 138 : index
    %c0_7 = arith.constant 0 : index
    %12 = vector.load %arg1[%c138, %c0_7] : memref<144x128xf32, #tpu.memory_space<vmem>>, vector<1x128xf32>
    %c0_8 = arith.constant 0 : index
    %c0_9 = arith.constant 0 : index
    %13 = vector.load %arg0[%c0_8, %c0_9] : memref<64x8xf32, #tpu.memory_space<vmem>>, vector<64x8xf32>
    %14 = arith.truncf %13 : vector<64x8xf32> to vector<64x8xbf16>
    %cst = arith.constant dense<0.000000e+00> : vector<64x128xf32>
    %15 = tpu.matmul %14, %1, %cst {dimension_numbers = #tpu.dot_dimension_numbers<[1], [0], [0], [1], [0, 0, 1, 1], [], []>} : vector<64x8xbf16>, vector<8x128xbf16>, vector<64x128xf32> -> vector<64x128xf32>
    %16 = vector.broadcast %10 : vector<1x128xf32> to vector<64x128xf32>
    %17 = arith.addf %15, %16 : vector<64x128xf32>
    %cst_10 = arith.constant 0.000000e+00 : f32
    %18 = vector.broadcast %cst_10 : f32 to vector<8x32xf32>
    %cst_11 = arith.constant 0.000000e+00 : f32
    %19 = vector.broadcast %cst_11 : f32 to vector<8x32xf32>
    %cst_12 = arith.constant 0.000000e+00 : f32
    %20 = vector.broadcast %cst_12 : f32 to vector<8x32xf32>
    %cst_13 = arith.constant 0.000000e+00 : f32
    %21 = vector.broadcast %cst_13 : f32 to vector<8x128xf32>
    %22 = vector.broadcast %11 : vector<1x128xf32> to vector<8x128xf32>
    %23 = arith.addf %21, %22 : vector<8x128xf32>
    %24 = arith.truncf %18 : vector<8x32xf32> to vector<8x32xbf16>
    %25 = vector.extract_strided_slice %17 {offsets = [0, 0], sizes = [8, 128], strides = [1, 1]} : vector<64x128xf32> to vector<8x128xf32>
    %cst_14 = arith.constant dense<0.000000e+00> : vector<8x128xf32>
    %26 = tpu.matmul %24, %3, %cst_14 {dimension_numbers = #tpu.dot_dimension_numbers<[1], [0], [0], [1], [0, 0, 1, 1], [], []>} : vector<8x32xbf16>, vector<32x128xbf16>, vector<8x128xf32> -> vector<8x128xf32>
    %27 = arith.addf %25, %26 : vector<8x128xf32>
    %28 = arith.negf %27 : vector<8x128xf32>
    %29 = math.exp %28 : vector<8x128xf32>
    %cst_15 = arith.constant 1.000000e+00 : f32
    %30 = vector.broadcast %cst_15 : f32 to vector<8x128xf32>
    %31 = arith.addf %30, %29 : vector<8x128xf32>
    %32 = arith.divf %30, %31 : vector<8x128xf32>
    %33 = vector.extract_strided_slice %32 {offsets = [0, 0], sizes = [8, 32], strides = [1, 1]} : vector<8x128xf32> to vector<8x32xf32>
    %34 = vector.extract_strided_slice %32 {offsets = [0, 32], sizes = [8, 32], strides = [1, 1]} : vector<8x128xf32> to vector<8x32xf32>
    %35 = vector.extract_strided_slice %32 {offsets = [0, 64], sizes = [8, 32], strides = [1, 1]} : vector<8x128xf32> to vector<8x32xf32>
    %cst_16 = arith.constant 2.000000e+00 : f32
    %36 = vector.broadcast %cst_16 : f32 to vector<8x32xf32>
    %37 = arith.mulf %36, %35 : vector<8x32xf32>
    %cst_17 = arith.constant 1.000000e+00 : f32
    %38 = vector.broadcast %cst_17 : f32 to vector<8x32xf32>
    %39 = arith.subf %37, %38 : vector<8x32xf32>
    %40 = vector.extract_strided_slice %32 {offsets = [0, 96], sizes = [8, 32], strides = [1, 1]} : vector<8x128xf32> to vector<8x32xf32>
    %41 = arith.mulf %34, %19 : vector<8x32xf32>
    %42 = arith.mulf %33, %39 : vector<8x32xf32>
    %43 = arith.addf %41, %42 : vector<8x32xf32>
    %cst_18 = arith.constant 2.000000e+00 : f32
    %44 = vector.broadcast %cst_18 : f32 to vector<8x32xf32>
    %45 = arith.mulf %44, %43 : vector<8x32xf32>
    %46 = arith.negf %45 : vector<8x32xf32>
    %47 = math.exp %46 : vector<8x32xf32>
    %cst_19 = arith.constant 1.000000e+00 : f32
    %48 = vector.broadcast %cst_19 : f32 to vector<8x32xf32>
    %49 = arith.addf %48, %47 : vector<8x32xf32>
    %50 = arith.divf %48, %49 : vector<8x32xf32>
    %cst_20 = arith.constant 2.000000e+00 : f32
    %51 = vector.broadcast %cst_20 : f32 to vector<8x32xf32>
    %52 = arith.mulf %51, %50 : vector<8x32xf32>
    %cst_21 = arith.constant 1.000000e+00 : f32
    %53 = vector.broadcast %cst_21 : f32 to vector<8x32xf32>
    %54 = arith.subf %52, %53 : vector<8x32xf32>
    %55 = arith.mulf %40, %54 : vector<8x32xf32>
    %56 = arith.truncf %55 : vector<8x32xf32> to vector<8x32xbf16>
    %cst_22 = arith.constant dense<0.000000e+00> : vector<8x128xf32>
    %57 = tpu.matmul %56, %5, %cst_22 {dimension_numbers = #tpu.dot_dimension_numbers<[1], [0], [0], [1], [0, 0, 1, 1], [], []>} : vector<8x32xbf16>, vector<32x128xbf16>, vector<8x128xf32> -> vector<8x128xf32>
    %58 = arith.addf %57, %23 : vector<8x128xf32>
    %59 = arith.negf %58 : vector<8x128xf32>
    %60 = math.exp %59 : vector<8x128xf32>
    %cst_23 = arith.constant 1.000000e+00 : f32
    %61 = vector.broadcast %cst_23 : f32 to vector<8x128xf32>
    %62 = arith.addf %61, %60 : vector<8x128xf32>
    %63 = arith.divf %61, %62 : vector<8x128xf32>
    %64 = vector.extract_strided_slice %63 {offsets = [0, 0], sizes = [8, 32], strides = [1, 1]} : vector<8x128xf32> to vector<8x32xf32>
    %65 = vector.extract_strided_slice %63 {offsets = [0, 32], sizes = [8, 32], strides = [1, 1]} : vector<8x128xf32> to vector<8x32xf32>
    %66 = vector.extract_strided_slice %63 {offsets = [0, 64], sizes = [8, 32], strides = [1, 1]} : vector<8x128xf32> to vector<8x32xf32>
    %cst_24 = arith.constant 2.000000e+00 : f32
    %67 = vector.broadcast %cst_24 : f32 to vector<8x32xf32>
    %68 = arith.mulf %67, %66 : vector<8x32xf32>
    %cst_25 = arith.constant 1.000000e+00 : f32
    %69 = vector.broadcast %cst_25 : f32 to vector<8x32xf32>
    %70 = arith.subf %68, %69 : vector<8x32xf32>
    %71 = vector.extract_strided_slice %63 {offsets = [0, 96], sizes = [8, 32], strides = [1, 1]} : vector<8x128xf32> to vector<8x32xf32>
    %72 = arith.mulf %65, %20 : vector<8x32xf32>
    %73 = arith.mulf %64, %70 : vector<8x32xf32>
    %74 = arith.addf %72, %73 : vector<8x32xf32>
    %cst_26 = arith.constant 2.000000e+00 : f32
    %75 = vector.broadcast %cst_26 : f32 to vector<8x32xf32>
    %76 = arith.mulf %75, %74 : vector<8x32xf32>
    %77 = arith.negf %76 : vector<8x32xf32>
    %78 = math.exp %77 : vector<8x32xf32>
    %cst_27 = arith.constant 1.000000e+00 : f32
    %79 = vector.broadcast %cst_27 : f32 to vector<8x32xf32>
    %80 = arith.addf %79, %78 : vector<8x32xf32>
    %81 = arith.divf %79, %80 : vector<8x32xf32>
    %cst_28 = arith.constant 2.000000e+00 : f32
    %82 = vector.broadcast %cst_28 : f32 to vector<8x32xf32>
    %83 = arith.mulf %82, %81 : vector<8x32xf32>
    %cst_29 = arith.constant 1.000000e+00 : f32
    %84 = vector.broadcast %cst_29 : f32 to vector<8x32xf32>
    %85 = arith.subf %83, %84 : vector<8x32xf32>
    %86 = arith.mulf %71, %85 : vector<8x32xf32>
    %87 = arith.truncf %86 : vector<8x32xf32> to vector<8x32xbf16>
    %cst_30 = arith.constant dense<0.000000e+00> : vector<8x128xf32>
    %88 = tpu.matmul %87, %7, %cst_30 {dimension_numbers = #tpu.dot_dimension_numbers<[1], [0], [0], [1], [0, 0, 1, 1], [], []>} : vector<8x32xbf16>, vector<32x128xbf16>, vector<8x128xf32> -> vector<8x128xf32>
    %89 = vector.broadcast %11 : vector<1x128xf32> to vector<8x128xf32>
    %90 = arith.addf %88, %89 : vector<8x128xf32>
    %91 = arith.truncf %55 : vector<8x32xf32> to vector<8x32xbf16>
    %92 = vector.extract_strided_slice %17 {offsets = [8, 0], sizes = [8, 128], strides = [1, 1]} : vector<64x128xf32> to vector<8x128xf32>
    %cst_31 = arith.constant dense<0.000000e+00> : vector<8x128xf32>
    %93 = tpu.matmul %91, %3, %cst_31 {dimension_numbers = #tpu.dot_dimension_numbers<[1], [0], [0], [1], [0, 0, 1, 1], [], []>} : vector<8x32xbf16>, vector<32x128xbf16>, vector<8x128xf32> -> vector<8x128xf32>
    %94 = arith.addf %92, %93 : vector<8x128xf32>
    %95 = arith.negf %94 : vector<8x128xf32>
    %96 = math.exp %95 : vector<8x128xf32>
    %cst_32 = arith.constant 1.000000e+00 : f32
    %97 = vector.broadcast %cst_32 : f32 to vector<8x128xf32>
    %98 = arith.addf %97, %96 : vector<8x128xf32>
    %99 = arith.divf %97, %98 : vector<8x128xf32>
    %100 = vector.extract_strided_slice %99 {offsets = [0, 0], sizes = [8, 32], strides = [1, 1]} : vector<8x128xf32> to vector<8x32xf32>
    %101 = vector.extract_strided_slice %99 {offsets = [0, 32], sizes = [8, 32], strides = [1, 1]} : vector<8x128xf32> to vector<8x32xf32>
    %102 = vector.extract_strided_slice %99 {offsets = [0, 64], sizes = [8, 32], strides = [1, 1]} : vector<8x128xf32> to vector<8x32xf32>
    %cst_33 = arith.constant 2.000000e+00 : f32
    %103 = vector.broadcast %cst_33 : f32 to vector<8x32xf32>
    %104 = arith.mulf %103, %102 : vector<8x32xf32>
    %cst_34 = arith.constant 1.000000e+00 : f32
    %105 = vector.broadcast %cst_34 : f32 to vector<8x32xf32>
    %106 = arith.subf %104, %105 : vector<8x32xf32>
    %107 = vector.extract_strided_slice %99 {offsets = [0, 96], sizes = [8, 32], strides = [1, 1]} : vector<8x128xf32> to vector<8x32xf32>
    %108 = arith.mulf %101, %43 : vector<8x32xf32>
    %109 = arith.mulf %100, %106 : vector<8x32xf32>
    %110 = arith.addf %108, %109 : vector<8x32xf32>
    %cst_35 = arith.constant 2.000000e+00 : f32
    %111 = vector.broadcast %cst_35 : f32 to vector<8x32xf32>
    %112 = arith.mulf %111, %110 : vector<8x32xf32>
    %113 = arith.negf %112 : vector<8x32xf32>
    %114 = math.exp %113 : vector<8x32xf32>
    %cst_36 = arith.constant 1.000000e+00 : f32
    %115 = vector.broadcast %cst_36 : f32 to vector<8x32xf32>
    %116 = arith.addf %115, %114 : vector<8x32xf32>
    %117 = arith.divf %115, %116 : vector<8x32xf32>
    %cst_37 = arith.constant 2.000000e+00 : f32
    %118 = vector.broadcast %cst_37 : f32 to vector<8x32xf32>
    %119 = arith.mulf %118, %117 : vector<8x32xf32>
    %cst_38 = arith.constant 1.000000e+00 : f32
    %120 = vector.broadcast %cst_38 : f32 to vector<8x32xf32>
    %121 = arith.subf %119, %120 : vector<8x32xf32>
    %122 = arith.mulf %107, %121 : vector<8x32xf32>
    %123 = arith.truncf %122 : vector<8x32xf32> to vector<8x32xbf16>
    %cst_39 = arith.constant dense<0.000000e+00> : vector<8x128xf32>
    %124 = tpu.matmul %123, %5, %cst_39 {dimension_numbers = #tpu.dot_dimension_numbers<[1], [0], [0], [1], [0, 0, 1, 1], [], []>} : vector<8x32xbf16>, vector<32x128xbf16>, vector<8x128xf32> -> vector<8x128xf32>
    %125 = arith.addf %124, %90 : vector<8x128xf32>
    %126 = arith.negf %125 : vector<8x128xf32>
    %127 = math.exp %126 : vector<8x128xf32>
    %cst_40 = arith.constant 1.000000e+00 : f32
    %128 = vector.broadcast %cst_40 : f32 to vector<8x128xf32>
    %129 = arith.addf %128, %127 : vector<8x128xf32>
    %130 = arith.divf %128, %129 : vector<8x128xf32>
    %131 = vector.extract_strided_slice %130 {offsets = [0, 0], sizes = [8, 32], strides = [1, 1]} : vector<8x128xf32> to vector<8x32xf32>
    %132 = vector.extract_strided_slice %130 {offsets = [0, 32], sizes = [8, 32], strides = [1, 1]} : vector<8x128xf32> to vector<8x32xf32>
    %133 = vector.extract_strided_slice %130 {offsets = [0, 64], sizes = [8, 32], strides = [1, 1]} : vector<8x128xf32> to vector<8x32xf32>
    %cst_41 = arith.constant 2.000000e+00 : f32
    %134 = vector.broadcast %cst_41 : f32 to vector<8x32xf32>
    %135 = arith.mulf %134, %133 : vector<8x32xf32>
    %cst_42 = arith.constant 1.000000e+00 : f32
    %136 = vector.broadcast %cst_42 : f32 to vector<8x32xf32>
    %137 = arith.subf %135, %136 : vector<8x32xf32>
    %138 = vector.extract_strided_slice %130 {offsets = [0, 96], sizes = [8, 32], strides = [1, 1]} : vector<8x128xf32> to vector<8x32xf32>
    %139 = arith.mulf %132, %74 : vector<8x32xf32>
    %140 = arith.mulf %131, %137 : vector<8x32xf32>
    %141 = arith.addf %139, %140 : vector<8x32xf32>
    %cst_43 = arith.constant 2.000000e+00 : f32
    %142 = vector.broadcast %cst_43 : f32 to vector<8x32xf32>
    %143 = arith.mulf %142, %141 : vector<8x32xf32>
    %144 = arith.negf %143 : vector<8x32xf32>
    %145 = math.exp %144 : vector<8x32xf32>
    %cst_44 = arith.constant 1.000000e+00 : f32
    %146 = vector.broadcast %cst_44 : f32 to vector<8x32xf32>
    %147 = arith.addf %146, %145 : vector<8x32xf32>
    %148 = arith.divf %146, %147 : vector<8x32xf32>
    %cst_45 = arith.constant 2.000000e+00 : f32
    %149 = vector.broadcast %cst_45 : f32 to vector<8x32xf32>
    %150 = arith.mulf %149, %148 : vector<8x32xf32>
    %cst_46 = arith.constant 1.000000e+00 : f32
    %151 = vector.broadcast %cst_46 : f32 to vector<8x32xf32>
    %152 = arith.subf %150, %151 : vector<8x32xf32>
    %153 = arith.mulf %138, %152 : vector<8x32xf32>
    %154 = arith.truncf %153 : vector<8x32xf32> to vector<8x32xbf16>
    %cst_47 = arith.constant dense<0.000000e+00> : vector<8x128xf32>
    %155 = tpu.matmul %154, %7, %cst_47 {dimension_numbers = #tpu.dot_dimension_numbers<[1], [0], [0], [1], [0, 0, 1, 1], [], []>} : vector<8x32xbf16>, vector<32x128xbf16>, vector<8x128xf32> -> vector<8x128xf32>
    %156 = vector.broadcast %11 : vector<1x128xf32> to vector<8x128xf32>
    %157 = arith.addf %155, %156 : vector<8x128xf32>
    %158 = arith.truncf %122 : vector<8x32xf32> to vector<8x32xbf16>
    %159 = vector.extract_strided_slice %17 {offsets = [16, 0], sizes = [8, 128], strides = [1, 1]} : vector<64x128xf32> to vector<8x128xf32>
    %cst_48 = arith.constant dense<0.000000e+00> : vector<8x128xf32>
    %160 = tpu.matmul %158, %3, %cst_48 {dimension_numbers = #tpu.dot_dimension_numbers<[1], [0], [0], [1], [0, 0, 1, 1], [], []>} : vector<8x32xbf16>, vector<32x128xbf16>, vector<8x128xf32> -> vector<8x128xf32>
    %161 = arith.addf %159, %160 : vector<8x128xf32>
    %162 = arith.negf %161 : vector<8x128xf32>
    %163 = math.exp %162 : vector<8x128xf32>
    %cst_49 = arith.constant 1.000000e+00 : f32
    %164 = vector.broadcast %cst_49 : f32 to vector<8x128xf32>
    %165 = arith.addf %164, %163 : vector<8x128xf32>
    %166 = arith.divf %164, %165 : vector<8x128xf32>
    %167 = vector.extract_strided_slice %166 {offsets = [0, 0], sizes = [8, 32], strides = [1, 1]} : vector<8x128xf32> to vector<8x32xf32>
    %168 = vector.extract_strided_slice %166 {offsets = [0, 32], sizes = [8, 32], strides = [1, 1]} : vector<8x128xf32> to vector<8x32xf32>
    %169 = vector.extract_strided_slice %166 {offsets = [0, 64], sizes = [8, 32], strides = [1, 1]} : vector<8x128xf32> to vector<8x32xf32>
    %cst_50 = arith.constant 2.000000e+00 : f32
    %170 = vector.broadcast %cst_50 : f32 to vector<8x32xf32>
    %171 = arith.mulf %170, %169 : vector<8x32xf32>
    %cst_51 = arith.constant 1.000000e+00 : f32
    %172 = vector.broadcast %cst_51 : f32 to vector<8x32xf32>
    %173 = arith.subf %171, %172 : vector<8x32xf32>
    %174 = vector.extract_strided_slice %166 {offsets = [0, 96], sizes = [8, 32], strides = [1, 1]} : vector<8x128xf32> to vector<8x32xf32>
    %175 = arith.mulf %168, %110 : vector<8x32xf32>
    %176 = arith.mulf %167, %173 : vector<8x32xf32>
    %177 = arith.addf %175, %176 : vector<8x32xf32>
    %cst_52 = arith.constant 2.000000e+00 : f32
    %178 = vector.broadcast %cst_52 : f32 to vector<8x32xf32>
    %179 = arith.mulf %178, %177 : vector<8x32xf32>
    %180 = arith.negf %179 : vector<8x32xf32>
    %181 = math.exp %180 : vector<8x32xf32>
    %cst_53 = arith.constant 1.000000e+00 : f32
    %182 = vector.broadcast %cst_53 : f32 to vector<8x32xf32>
    %183 = arith.addf %182, %181 : vector<8x32xf32>
    %184 = arith.divf %182, %183 : vector<8x32xf32>
    %cst_54 = arith.constant 2.000000e+00 : f32
    %185 = vector.broadcast %cst_54 : f32 to vector<8x32xf32>
    %186 = arith.mulf %185, %184 : vector<8x32xf32>
    %cst_55 = arith.constant 1.000000e+00 : f32
    %187 = vector.broadcast %cst_55 : f32 to vector<8x32xf32>
    %188 = arith.subf %186, %187 : vector<8x32xf32>
    %189 = arith.mulf %174, %188 : vector<8x32xf32>
    %190 = arith.truncf %189 : vector<8x32xf32> to vector<8x32xbf16>
    %cst_56 = arith.constant dense<0.000000e+00> : vector<8x128xf32>
    %191 = tpu.matmul %190, %5, %cst_56 {dimension_numbers = #tpu.dot_dimension_numbers<[1], [0], [0], [1], [0, 0, 1, 1], [], []>} : vector<8x32xbf16>, vector<32x128xbf16>, vector<8x128xf32> -> vector<8x128xf32>
    %192 = arith.addf %191, %157 : vector<8x128xf32>
    %193 = arith.negf %192 : vector<8x128xf32>
    %194 = math.exp %193 : vector<8x128xf32>
    %cst_57 = arith.constant 1.000000e+00 : f32
    %195 = vector.broadcast %cst_57 : f32 to vector<8x128xf32>
    %196 = arith.addf %195, %194 : vector<8x128xf32>
    %197 = arith.divf %195, %196 : vector<8x128xf32>
    %198 = vector.extract_strided_slice %197 {offsets = [0, 0], sizes = [8, 32], strides = [1, 1]} : vector<8x128xf32> to vector<8x32xf32>
    %199 = vector.extract_strided_slice %197 {offsets = [0, 32], sizes = [8, 32], strides = [1, 1]} : vector<8x128xf32> to vector<8x32xf32>
    %200 = vector.extract_strided_slice %197 {offsets = [0, 64], sizes = [8, 32], strides = [1, 1]} : vector<8x128xf32> to vector<8x32xf32>
    %cst_58 = arith.constant 2.000000e+00 : f32
    %201 = vector.broadcast %cst_58 : f32 to vector<8x32xf32>
    %202 = arith.mulf %201, %200 : vector<8x32xf32>
    %cst_59 = arith.constant 1.000000e+00 : f32
    %203 = vector.broadcast %cst_59 : f32 to vector<8x32xf32>
    %204 = arith.subf %202, %203 : vector<8x32xf32>
    %205 = vector.extract_strided_slice %197 {offsets = [0, 96], sizes = [8, 32], strides = [1, 1]} : vector<8x128xf32> to vector<8x32xf32>
    %206 = arith.mulf %199, %141 : vector<8x32xf32>
    %207 = arith.mulf %198, %204 : vector<8x32xf32>
    %208 = arith.addf %206, %207 : vector<8x32xf32>
    %cst_60 = arith.constant 2.000000e+00 : f32
    %209 = vector.broadcast %cst_60 : f32 to vector<8x32xf32>
    %210 = arith.mulf %209, %208 : vector<8x32xf32>
    %211 = arith.negf %210 : vector<8x32xf32>
    %212 = math.exp %211 : vector<8x32xf32>
    %cst_61 = arith.constant 1.000000e+00 : f32
    %213 = vector.broadcast %cst_61 : f32 to vector<8x32xf32>
    %214 = arith.addf %213, %212 : vector<8x32xf32>
    %215 = arith.divf %213, %214 : vector<8x32xf32>
    %cst_62 = arith.constant 2.000000e+00 : f32
    %216 = vector.broadcast %cst_62 : f32 to vector<8x32xf32>
    %217 = arith.mulf %216, %215 : vector<8x32xf32>
    %cst_63 = arith.constant 1.000000e+00 : f32
    %218 = vector.broadcast %cst_63 : f32 to vector<8x32xf32>
    %219 = arith.subf %217, %218 : vector<8x32xf32>
    %220 = arith.mulf %205, %219 : vector<8x32xf32>
    %221 = arith.truncf %220 : vector<8x32xf32> to vector<8x32xbf16>
    %cst_64 = arith.constant dense<0.000000e+00> : vector<8x128xf32>
    %222 = tpu.matmul %221, %7, %cst_64 {dimension_numbers = #tpu.dot_dimension_numbers<[1], [0], [0], [1], [0, 0, 1, 1], [], []>} : vector<8x32xbf16>, vector<32x128xbf16>, vector<8x128xf32> -> vector<8x128xf32>
    %223 = vector.broadcast %11 : vector<1x128xf32> to vector<8x128xf32>
    %224 = arith.addf %222, %223 : vector<8x128xf32>
    %225 = arith.truncf %189 : vector<8x32xf32> to vector<8x32xbf16>
    %226 = vector.extract_strided_slice %17 {offsets = [24, 0], sizes = [8, 128], strides = [1, 1]} : vector<64x128xf32> to vector<8x128xf32>
    %cst_65 = arith.constant dense<0.000000e+00> : vector<8x128xf32>
    %227 = tpu.matmul %225, %3, %cst_65 {dimension_numbers = #tpu.dot_dimension_numbers<[1], [0], [0], [1], [0, 0, 1, 1], [], []>} : vector<8x32xbf16>, vector<32x128xbf16>, vector<8x128xf32> -> vector<8x128xf32>
    %228 = arith.addf %226, %227 : vector<8x128xf32>
    %229 = arith.negf %228 : vector<8x128xf32>
    %230 = math.exp %229 : vector<8x128xf32>
    %cst_66 = arith.constant 1.000000e+00 : f32
    %231 = vector.broadcast %cst_66 : f32 to vector<8x128xf32>
    %232 = arith.addf %231, %230 : vector<8x128xf32>
    %233 = arith.divf %231, %232 : vector<8x128xf32>
    %234 = vector.extract_strided_slice %233 {offsets = [0, 0], sizes = [8, 32], strides = [1, 1]} : vector<8x128xf32> to vector<8x32xf32>
    %235 = vector.extract_strided_slice %233 {offsets = [0, 32], sizes = [8, 32], strides = [1, 1]} : vector<8x128xf32> to vector<8x32xf32>
    %236 = vector.extract_strided_slice %233 {offsets = [0, 64], sizes = [8, 32], strides = [1, 1]} : vector<8x128xf32> to vector<8x32xf32>
    %cst_67 = arith.constant 2.000000e+00 : f32
    %237 = vector.broadcast %cst_67 : f32 to vector<8x32xf32>
    %238 = arith.mulf %237, %236 : vector<8x32xf32>
    %cst_68 = arith.constant 1.000000e+00 : f32
    %239 = vector.broadcast %cst_68 : f32 to vector<8x32xf32>
    %240 = arith.subf %238, %239 : vector<8x32xf32>
    %241 = vector.extract_strided_slice %233 {offsets = [0, 96], sizes = [8, 32], strides = [1, 1]} : vector<8x128xf32> to vector<8x32xf32>
    %242 = arith.mulf %235, %177 : vector<8x32xf32>
    %243 = arith.mulf %234, %240 : vector<8x32xf32>
    %244 = arith.addf %242, %243 : vector<8x32xf32>
    %cst_69 = arith.constant 2.000000e+00 : f32
    %245 = vector.broadcast %cst_69 : f32 to vector<8x32xf32>
    %246 = arith.mulf %245, %244 : vector<8x32xf32>
    %247 = arith.negf %246 : vector<8x32xf32>
    %248 = math.exp %247 : vector<8x32xf32>
    %cst_70 = arith.constant 1.000000e+00 : f32
    %249 = vector.broadcast %cst_70 : f32 to vector<8x32xf32>
    %250 = arith.addf %249, %248 : vector<8x32xf32>
    %251 = arith.divf %249, %250 : vector<8x32xf32>
    %cst_71 = arith.constant 2.000000e+00 : f32
    %252 = vector.broadcast %cst_71 : f32 to vector<8x32xf32>
    %253 = arith.mulf %252, %251 : vector<8x32xf32>
    %cst_72 = arith.constant 1.000000e+00 : f32
    %254 = vector.broadcast %cst_72 : f32 to vector<8x32xf32>
    %255 = arith.subf %253, %254 : vector<8x32xf32>
    %256 = arith.mulf %241, %255 : vector<8x32xf32>
    %257 = arith.truncf %256 : vector<8x32xf32> to vector<8x32xbf16>
    %cst_73 = arith.constant dense<0.000000e+00> : vector<8x128xf32>
    %258 = tpu.matmul %257, %5, %cst_73 {dimension_numbers = #tpu.dot_dimension_numbers<[1], [0], [0], [1], [0, 0, 1, 1], [], []>} : vector<8x32xbf16>, vector<32x128xbf16>, vector<8x128xf32> -> vector<8x128xf32>
    %259 = arith.addf %258, %224 : vector<8x128xf32>
    %260 = arith.negf %259 : vector<8x128xf32>
    %261 = math.exp %260 : vector<8x128xf32>
    %cst_74 = arith.constant 1.000000e+00 : f32
    %262 = vector.broadcast %cst_74 : f32 to vector<8x128xf32>
    %263 = arith.addf %262, %261 : vector<8x128xf32>
    %264 = arith.divf %262, %263 : vector<8x128xf32>
    %265 = vector.extract_strided_slice %264 {offsets = [0, 0], sizes = [8, 32], strides = [1, 1]} : vector<8x128xf32> to vector<8x32xf32>
    %266 = vector.extract_strided_slice %264 {offsets = [0, 32], sizes = [8, 32], strides = [1, 1]} : vector<8x128xf32> to vector<8x32xf32>
    %267 = vector.extract_strided_slice %264 {offsets = [0, 64], sizes = [8, 32], strides = [1, 1]} : vector<8x128xf32> to vector<8x32xf32>
    %cst_75 = arith.constant 2.000000e+00 : f32
    %268 = vector.broadcast %cst_75 : f32 to vector<8x32xf32>
    %269 = arith.mulf %268, %267 : vector<8x32xf32>
    %cst_76 = arith.constant 1.000000e+00 : f32
    %270 = vector.broadcast %cst_76 : f32 to vector<8x32xf32>
    %271 = arith.subf %269, %270 : vector<8x32xf32>
    %272 = vector.extract_strided_slice %264 {offsets = [0, 96], sizes = [8, 32], strides = [1, 1]} : vector<8x128xf32> to vector<8x32xf32>
    %273 = arith.mulf %266, %208 : vector<8x32xf32>
    %274 = arith.mulf %265, %271 : vector<8x32xf32>
    %275 = arith.addf %273, %274 : vector<8x32xf32>
    %cst_77 = arith.constant 2.000000e+00 : f32
    %276 = vector.broadcast %cst_77 : f32 to vector<8x32xf32>
    %277 = arith.mulf %276, %275 : vector<8x32xf32>
    %278 = arith.negf %277 : vector<8x32xf32>
    %279 = math.exp %278 : vector<8x32xf32>
    %cst_78 = arith.constant 1.000000e+00 : f32
    %280 = vector.broadcast %cst_78 : f32 to vector<8x32xf32>
    %281 = arith.addf %280, %279 : vector<8x32xf32>
    %282 = arith.divf %280, %281 : vector<8x32xf32>
    %cst_79 = arith.constant 2.000000e+00 : f32
    %283 = vector.broadcast %cst_79 : f32 to vector<8x32xf32>
    %284 = arith.mulf %283, %282 : vector<8x32xf32>
    %cst_80 = arith.constant 1.000000e+00 : f32
    %285 = vector.broadcast %cst_80 : f32 to vector<8x32xf32>
    %286 = arith.subf %284, %285 : vector<8x32xf32>
    %287 = arith.mulf %272, %286 : vector<8x32xf32>
    %288 = arith.truncf %287 : vector<8x32xf32> to vector<8x32xbf16>
    %cst_81 = arith.constant dense<0.000000e+00> : vector<8x128xf32>
    %289 = tpu.matmul %288, %7, %cst_81 {dimension_numbers = #tpu.dot_dimension_numbers<[1], [0], [0], [1], [0, 0, 1, 1], [], []>} : vector<8x32xbf16>, vector<32x128xbf16>, vector<8x128xf32> -> vector<8x128xf32>
    %290 = vector.broadcast %11 : vector<1x128xf32> to vector<8x128xf32>
    %291 = arith.addf %289, %290 : vector<8x128xf32>
    %292 = arith.truncf %256 : vector<8x32xf32> to vector<8x32xbf16>
    %293 = vector.extract_strided_slice %17 {offsets = [32, 0], sizes = [8, 128], strides = [1, 1]} : vector<64x128xf32> to vector<8x128xf32>
    %cst_82 = arith.constant dense<0.000000e+00> : vector<8x128xf32>
    %294 = tpu.matmul %292, %3, %cst_82 {dimension_numbers = #tpu.dot_dimension_numbers<[1], [0], [0], [1], [0, 0, 1, 1], [], []>} : vector<8x32xbf16>, vector<32x128xbf16>, vector<8x128xf32> -> vector<8x128xf32>
    %295 = arith.addf %293, %294 : vector<8x128xf32>
    %296 = arith.negf %295 : vector<8x128xf32>
    %297 = math.exp %296 : vector<8x128xf32>
    %cst_83 = arith.constant 1.000000e+00 : f32
    %298 = vector.broadcast %cst_83 : f32 to vector<8x128xf32>
    %299 = arith.addf %298, %297 : vector<8x128xf32>
    %300 = arith.divf %298, %299 : vector<8x128xf32>
    %301 = vector.extract_strided_slice %300 {offsets = [0, 0], sizes = [8, 32], strides = [1, 1]} : vector<8x128xf32> to vector<8x32xf32>
    %302 = vector.extract_strided_slice %300 {offsets = [0, 32], sizes = [8, 32], strides = [1, 1]} : vector<8x128xf32> to vector<8x32xf32>
    %303 = vector.extract_strided_slice %300 {offsets = [0, 64], sizes = [8, 32], strides = [1, 1]} : vector<8x128xf32> to vector<8x32xf32>
    %cst_84 = arith.constant 2.000000e+00 : f32
    %304 = vector.broadcast %cst_84 : f32 to vector<8x32xf32>
    %305 = arith.mulf %304, %303 : vector<8x32xf32>
    %cst_85 = arith.constant 1.000000e+00 : f32
    %306 = vector.broadcast %cst_85 : f32 to vector<8x32xf32>
    %307 = arith.subf %305, %306 : vector<8x32xf32>
    %308 = vector.extract_strided_slice %300 {offsets = [0, 96], sizes = [8, 32], strides = [1, 1]} : vector<8x128xf32> to vector<8x32xf32>
    %309 = arith.mulf %302, %244 : vector<8x32xf32>
    %310 = arith.mulf %301, %307 : vector<8x32xf32>
    %311 = arith.addf %309, %310 : vector<8x32xf32>
    %cst_86 = arith.constant 2.000000e+00 : f32
    %312 = vector.broadcast %cst_86 : f32 to vector<8x32xf32>
    %313 = arith.mulf %312, %311 : vector<8x32xf32>
    %314 = arith.negf %313 : vector<8x32xf32>
    %315 = math.exp %314 : vector<8x32xf32>
    %cst_87 = arith.constant 1.000000e+00 : f32
    %316 = vector.broadcast %cst_87 : f32 to vector<8x32xf32>
    %317 = arith.addf %316, %315 : vector<8x32xf32>
    %318 = arith.divf %316, %317 : vector<8x32xf32>
    %cst_88 = arith.constant 2.000000e+00 : f32
    %319 = vector.broadcast %cst_88 : f32 to vector<8x32xf32>
    %320 = arith.mulf %319, %318 : vector<8x32xf32>
    %cst_89 = arith.constant 1.000000e+00 : f32
    %321 = vector.broadcast %cst_89 : f32 to vector<8x32xf32>
    %322 = arith.subf %320, %321 : vector<8x32xf32>
    %323 = arith.mulf %308, %322 : vector<8x32xf32>
    %324 = arith.truncf %323 : vector<8x32xf32> to vector<8x32xbf16>
    %cst_90 = arith.constant dense<0.000000e+00> : vector<8x128xf32>
    %325 = tpu.matmul %324, %5, %cst_90 {dimension_numbers = #tpu.dot_dimension_numbers<[1], [0], [0], [1], [0, 0, 1, 1], [], []>} : vector<8x32xbf16>, vector<32x128xbf16>, vector<8x128xf32> -> vector<8x128xf32>
    %326 = arith.addf %325, %291 : vector<8x128xf32>
    %327 = arith.negf %326 : vector<8x128xf32>
    %328 = math.exp %327 : vector<8x128xf32>
    %cst_91 = arith.constant 1.000000e+00 : f32
    %329 = vector.broadcast %cst_91 : f32 to vector<8x128xf32>
    %330 = arith.addf %329, %328 : vector<8x128xf32>
    %331 = arith.divf %329, %330 : vector<8x128xf32>
    %332 = vector.extract_strided_slice %331 {offsets = [0, 0], sizes = [8, 32], strides = [1, 1]} : vector<8x128xf32> to vector<8x32xf32>
    %333 = vector.extract_strided_slice %331 {offsets = [0, 32], sizes = [8, 32], strides = [1, 1]} : vector<8x128xf32> to vector<8x32xf32>
    %334 = vector.extract_strided_slice %331 {offsets = [0, 64], sizes = [8, 32], strides = [1, 1]} : vector<8x128xf32> to vector<8x32xf32>
    %cst_92 = arith.constant 2.000000e+00 : f32
    %335 = vector.broadcast %cst_92 : f32 to vector<8x32xf32>
    %336 = arith.mulf %335, %334 : vector<8x32xf32>
    %cst_93 = arith.constant 1.000000e+00 : f32
    %337 = vector.broadcast %cst_93 : f32 to vector<8x32xf32>
    %338 = arith.subf %336, %337 : vector<8x32xf32>
    %339 = vector.extract_strided_slice %331 {offsets = [0, 96], sizes = [8, 32], strides = [1, 1]} : vector<8x128xf32> to vector<8x32xf32>
    %340 = arith.mulf %333, %275 : vector<8x32xf32>
    %341 = arith.mulf %332, %338 : vector<8x32xf32>
    %342 = arith.addf %340, %341 : vector<8x32xf32>
    %cst_94 = arith.constant 2.000000e+00 : f32
    %343 = vector.broadcast %cst_94 : f32 to vector<8x32xf32>
    %344 = arith.mulf %343, %342 : vector<8x32xf32>
    %345 = arith.negf %344 : vector<8x32xf32>
    %346 = math.exp %345 : vector<8x32xf32>
    %cst_95 = arith.constant 1.000000e+00 : f32
    %347 = vector.broadcast %cst_95 : f32 to vector<8x32xf32>
    %348 = arith.addf %347, %346 : vector<8x32xf32>
    %349 = arith.divf %347, %348 : vector<8x32xf32>
    %cst_96 = arith.constant 2.000000e+00 : f32
    %350 = vector.broadcast %cst_96 : f32 to vector<8x32xf32>
    %351 = arith.mulf %350, %349 : vector<8x32xf32>
    %cst_97 = arith.constant 1.000000e+00 : f32
    %352 = vector.broadcast %cst_97 : f32 to vector<8x32xf32>
    %353 = arith.subf %351, %352 : vector<8x32xf32>
    %354 = arith.mulf %339, %353 : vector<8x32xf32>
    %355 = arith.truncf %354 : vector<8x32xf32> to vector<8x32xbf16>
    %cst_98 = arith.constant dense<0.000000e+00> : vector<8x128xf32>
    %356 = tpu.matmul %355, %7, %cst_98 {dimension_numbers = #tpu.dot_dimension_numbers<[1], [0], [0], [1], [0, 0, 1, 1], [], []>} : vector<8x32xbf16>, vector<32x128xbf16>, vector<8x128xf32> -> vector<8x128xf32>
    %357 = vector.broadcast %11 : vector<1x128xf32> to vector<8x128xf32>
    %358 = arith.addf %356, %357 : vector<8x128xf32>
    %359 = arith.truncf %323 : vector<8x32xf32> to vector<8x32xbf16>
    %360 = vector.extract_strided_slice %17 {offsets = [40, 0], sizes = [8, 128], strides = [1, 1]} : vector<64x128xf32> to vector<8x128xf32>
    %cst_99 = arith.constant dense<0.000000e+00> : vector<8x128xf32>
    %361 = tpu.matmul %359, %3, %cst_99 {dimension_numbers = #tpu.dot_dimension_numbers<[1], [0], [0], [1], [0, 0, 1, 1], [], []>} : vector<8x32xbf16>, vector<32x128xbf16>, vector<8x128xf32> -> vector<8x128xf32>
    %362 = arith.addf %360, %361 : vector<8x128xf32>
    %363 = arith.negf %362 : vector<8x128xf32>
    %364 = math.exp %363 : vector<8x128xf32>
    %cst_100 = arith.constant 1.000000e+00 : f32
    %365 = vector.broadcast %cst_100 : f32 to vector<8x128xf32>
    %366 = arith.addf %365, %364 : vector<8x128xf32>
    %367 = arith.divf %365, %366 : vector<8x128xf32>
    %368 = vector.extract_strided_slice %367 {offsets = [0, 0], sizes = [8, 32], strides = [1, 1]} : vector<8x128xf32> to vector<8x32xf32>
    %369 = vector.extract_strided_slice %367 {offsets = [0, 32], sizes = [8, 32], strides = [1, 1]} : vector<8x128xf32> to vector<8x32xf32>
    %370 = vector.extract_strided_slice %367 {offsets = [0, 64], sizes = [8, 32], strides = [1, 1]} : vector<8x128xf32> to vector<8x32xf32>
    %cst_101 = arith.constant 2.000000e+00 : f32
    %371 = vector.broadcast %cst_101 : f32 to vector<8x32xf32>
    %372 = arith.mulf %371, %370 : vector<8x32xf32>
    %cst_102 = arith.constant 1.000000e+00 : f32
    %373 = vector.broadcast %cst_102 : f32 to vector<8x32xf32>
    %374 = arith.subf %372, %373 : vector<8x32xf32>
    %375 = vector.extract_strided_slice %367 {offsets = [0, 96], sizes = [8, 32], strides = [1, 1]} : vector<8x128xf32> to vector<8x32xf32>
    %376 = arith.mulf %369, %311 : vector<8x32xf32>
    %377 = arith.mulf %368, %374 : vector<8x32xf32>
    %378 = arith.addf %376, %377 : vector<8x32xf32>
    %cst_103 = arith.constant 2.000000e+00 : f32
    %379 = vector.broadcast %cst_103 : f32 to vector<8x32xf32>
    %380 = arith.mulf %379, %378 : vector<8x32xf32>
    %381 = arith.negf %380 : vector<8x32xf32>
    %382 = math.exp %381 : vector<8x32xf32>
    %cst_104 = arith.constant 1.000000e+00 : f32
    %383 = vector.broadcast %cst_104 : f32 to vector<8x32xf32>
    %384 = arith.addf %383, %382 : vector<8x32xf32>
    %385 = arith.divf %383, %384 : vector<8x32xf32>
    %cst_105 = arith.constant 2.000000e+00 : f32
    %386 = vector.broadcast %cst_105 : f32 to vector<8x32xf32>
    %387 = arith.mulf %386, %385 : vector<8x32xf32>
    %cst_106 = arith.constant 1.000000e+00 : f32
    %388 = vector.broadcast %cst_106 : f32 to vector<8x32xf32>
    %389 = arith.subf %387, %388 : vector<8x32xf32>
    %390 = arith.mulf %375, %389 : vector<8x32xf32>
    %391 = arith.truncf %390 : vector<8x32xf32> to vector<8x32xbf16>
    %cst_107 = arith.constant dense<0.000000e+00> : vector<8x128xf32>
    %392 = tpu.matmul %391, %5, %cst_107 {dimension_numbers = #tpu.dot_dimension_numbers<[1], [0], [0], [1], [0, 0, 1, 1], [], []>} : vector<8x32xbf16>, vector<32x128xbf16>, vector<8x128xf32> -> vector<8x128xf32>
    %393 = arith.addf %392, %358 : vector<8x128xf32>
    %394 = arith.negf %393 : vector<8x128xf32>
    %395 = math.exp %394 : vector<8x128xf32>
    %cst_108 = arith.constant 1.000000e+00 : f32
    %396 = vector.broadcast %cst_108 : f32 to vector<8x128xf32>
    %397 = arith.addf %396, %395 : vector<8x128xf32>
    %398 = arith.divf %396, %397 : vector<8x128xf32>
    %399 = vector.extract_strided_slice %398 {offsets = [0, 0], sizes = [8, 32], strides = [1, 1]} : vector<8x128xf32> to vector<8x32xf32>
    %400 = vector.extract_strided_slice %398 {offsets = [0, 32], sizes = [8, 32], strides = [1, 1]} : vector<8x128xf32> to vector<8x32xf32>
    %401 = vector.extract_strided_slice %398 {offsets = [0, 64], sizes = [8, 32], strides = [1, 1]} : vector<8x128xf32> to vector<8x32xf32>
    %cst_109 = arith.constant 2.000000e+00 : f32
    %402 = vector.broadcast %cst_109 : f32 to vector<8x32xf32>
    %403 = arith.mulf %402, %401 : vector<8x32xf32>
    %cst_110 = arith.constant 1.000000e+00 : f32
    %404 = vector.broadcast %cst_110 : f32 to vector<8x32xf32>
    %405 = arith.subf %403, %404 : vector<8x32xf32>
    %406 = vector.extract_strided_slice %398 {offsets = [0, 96], sizes = [8, 32], strides = [1, 1]} : vector<8x128xf32> to vector<8x32xf32>
    %407 = arith.mulf %400, %342 : vector<8x32xf32>
    %408 = arith.mulf %399, %405 : vector<8x32xf32>
    %409 = arith.addf %407, %408 : vector<8x32xf32>
    %cst_111 = arith.constant 2.000000e+00 : f32
    %410 = vector.broadcast %cst_111 : f32 to vector<8x32xf32>
    %411 = arith.mulf %410, %409 : vector<8x32xf32>
    %412 = arith.negf %411 : vector<8x32xf32>
    %413 = math.exp %412 : vector<8x32xf32>
    %cst_112 = arith.constant 1.000000e+00 : f32
    %414 = vector.broadcast %cst_112 : f32 to vector<8x32xf32>
    %415 = arith.addf %414, %413 : vector<8x32xf32>
    %416 = arith.divf %414, %415 : vector<8x32xf32>
    %cst_113 = arith.constant 2.000000e+00 : f32
    %417 = vector.broadcast %cst_113 : f32 to vector<8x32xf32>
    %418 = arith.mulf %417, %416 : vector<8x32xf32>
    %cst_114 = arith.constant 1.000000e+00 : f32
    %419 = vector.broadcast %cst_114 : f32 to vector<8x32xf32>
    %420 = arith.subf %418, %419 : vector<8x32xf32>
    %421 = arith.mulf %406, %420 : vector<8x32xf32>
    %422 = arith.truncf %421 : vector<8x32xf32> to vector<8x32xbf16>
    %cst_115 = arith.constant dense<0.000000e+00> : vector<8x128xf32>
    %423 = tpu.matmul %422, %7, %cst_115 {dimension_numbers = #tpu.dot_dimension_numbers<[1], [0], [0], [1], [0, 0, 1, 1], [], []>} : vector<8x32xbf16>, vector<32x128xbf16>, vector<8x128xf32> -> vector<8x128xf32>
    %424 = vector.broadcast %11 : vector<1x128xf32> to vector<8x128xf32>
    %425 = arith.addf %423, %424 : vector<8x128xf32>
    %426 = arith.truncf %390 : vector<8x32xf32> to vector<8x32xbf16>
    %427 = vector.extract_strided_slice %17 {offsets = [48, 0], sizes = [8, 128], strides = [1, 1]} : vector<64x128xf32> to vector<8x128xf32>
    %cst_116 = arith.constant dense<0.000000e+00> : vector<8x128xf32>
    %428 = tpu.matmul %426, %3, %cst_116 {dimension_numbers = #tpu.dot_dimension_numbers<[1], [0], [0], [1], [0, 0, 1, 1], [], []>} : vector<8x32xbf16>, vector<32x128xbf16>, vector<8x128xf32> -> vector<8x128xf32>
    %429 = arith.addf %427, %428 : vector<8x128xf32>
    %430 = arith.negf %429 : vector<8x128xf32>
    %431 = math.exp %430 : vector<8x128xf32>
    %cst_117 = arith.constant 1.000000e+00 : f32
    %432 = vector.broadcast %cst_117 : f32 to vector<8x128xf32>
    %433 = arith.addf %432, %431 : vector<8x128xf32>
    %434 = arith.divf %432, %433 : vector<8x128xf32>
    %435 = vector.extract_strided_slice %434 {offsets = [0, 0], sizes = [8, 32], strides = [1, 1]} : vector<8x128xf32> to vector<8x32xf32>
    %436 = vector.extract_strided_slice %434 {offsets = [0, 32], sizes = [8, 32], strides = [1, 1]} : vector<8x128xf32> to vector<8x32xf32>
    %437 = vector.extract_strided_slice %434 {offsets = [0, 64], sizes = [8, 32], strides = [1, 1]} : vector<8x128xf32> to vector<8x32xf32>
    %cst_118 = arith.constant 2.000000e+00 : f32
    %438 = vector.broadcast %cst_118 : f32 to vector<8x32xf32>
    %439 = arith.mulf %438, %437 : vector<8x32xf32>
    %cst_119 = arith.constant 1.000000e+00 : f32
    %440 = vector.broadcast %cst_119 : f32 to vector<8x32xf32>
    %441 = arith.subf %439, %440 : vector<8x32xf32>
    %442 = vector.extract_strided_slice %434 {offsets = [0, 96], sizes = [8, 32], strides = [1, 1]} : vector<8x128xf32> to vector<8x32xf32>
    %443 = arith.mulf %436, %378 : vector<8x32xf32>
    %444 = arith.mulf %435, %441 : vector<8x32xf32>
    %445 = arith.addf %443, %444 : vector<8x32xf32>
    %cst_120 = arith.constant 2.000000e+00 : f32
    %446 = vector.broadcast %cst_120 : f32 to vector<8x32xf32>
    %447 = arith.mulf %446, %445 : vector<8x32xf32>
    %448 = arith.negf %447 : vector<8x32xf32>
    %449 = math.exp %448 : vector<8x32xf32>
    %cst_121 = arith.constant 1.000000e+00 : f32
    %450 = vector.broadcast %cst_121 : f32 to vector<8x32xf32>
    %451 = arith.addf %450, %449 : vector<8x32xf32>
    %452 = arith.divf %450, %451 : vector<8x32xf32>
    %cst_122 = arith.constant 2.000000e+00 : f32
    %453 = vector.broadcast %cst_122 : f32 to vector<8x32xf32>
    %454 = arith.mulf %453, %452 : vector<8x32xf32>
    %cst_123 = arith.constant 1.000000e+00 : f32
    %455 = vector.broadcast %cst_123 : f32 to vector<8x32xf32>
    %456 = arith.subf %454, %455 : vector<8x32xf32>
    %457 = arith.mulf %442, %456 : vector<8x32xf32>
    %458 = arith.truncf %457 : vector<8x32xf32> to vector<8x32xbf16>
    %cst_124 = arith.constant dense<0.000000e+00> : vector<8x128xf32>
    %459 = tpu.matmul %458, %5, %cst_124 {dimension_numbers = #tpu.dot_dimension_numbers<[1], [0], [0], [1], [0, 0, 1, 1], [], []>} : vector<8x32xbf16>, vector<32x128xbf16>, vector<8x128xf32> -> vector<8x128xf32>
    %460 = arith.addf %459, %425 : vector<8x128xf32>
    %461 = arith.negf %460 : vector<8x128xf32>
    %462 = math.exp %461 : vector<8x128xf32>
    %cst_125 = arith.constant 1.000000e+00 : f32
    %463 = vector.broadcast %cst_125 : f32 to vector<8x128xf32>
    %464 = arith.addf %463, %462 : vector<8x128xf32>
    %465 = arith.divf %463, %464 : vector<8x128xf32>
    %466 = vector.extract_strided_slice %465 {offsets = [0, 0], sizes = [8, 32], strides = [1, 1]} : vector<8x128xf32> to vector<8x32xf32>
    %467 = vector.extract_strided_slice %465 {offsets = [0, 32], sizes = [8, 32], strides = [1, 1]} : vector<8x128xf32> to vector<8x32xf32>
    %468 = vector.extract_strided_slice %465 {offsets = [0, 64], sizes = [8, 32], strides = [1, 1]} : vector<8x128xf32> to vector<8x32xf32>
    %cst_126 = arith.constant 2.000000e+00 : f32
    %469 = vector.broadcast %cst_126 : f32 to vector<8x32xf32>
    %470 = arith.mulf %469, %468 : vector<8x32xf32>
    %cst_127 = arith.constant 1.000000e+00 : f32
    %471 = vector.broadcast %cst_127 : f32 to vector<8x32xf32>
    %472 = arith.subf %470, %471 : vector<8x32xf32>
    %473 = vector.extract_strided_slice %465 {offsets = [0, 96], sizes = [8, 32], strides = [1, 1]} : vector<8x128xf32> to vector<8x32xf32>
    %474 = arith.mulf %467, %409 : vector<8x32xf32>
    %475 = arith.mulf %466, %472 : vector<8x32xf32>
    %476 = arith.addf %474, %475 : vector<8x32xf32>
    %cst_128 = arith.constant 2.000000e+00 : f32
    %477 = vector.broadcast %cst_128 : f32 to vector<8x32xf32>
    %478 = arith.mulf %477, %476 : vector<8x32xf32>
    %479 = arith.negf %478 : vector<8x32xf32>
    %480 = math.exp %479 : vector<8x32xf32>
    %cst_129 = arith.constant 1.000000e+00 : f32
    %481 = vector.broadcast %cst_129 : f32 to vector<8x32xf32>
    %482 = arith.addf %481, %480 : vector<8x32xf32>
    %483 = arith.divf %481, %482 : vector<8x32xf32>
    %cst_130 = arith.constant 2.000000e+00 : f32
    %484 = vector.broadcast %cst_130 : f32 to vector<8x32xf32>
    %485 = arith.mulf %484, %483 : vector<8x32xf32>
    %cst_131 = arith.constant 1.000000e+00 : f32
    %486 = vector.broadcast %cst_131 : f32 to vector<8x32xf32>
    %487 = arith.subf %485, %486 : vector<8x32xf32>
    %488 = arith.mulf %473, %487 : vector<8x32xf32>
    %489 = arith.truncf %488 : vector<8x32xf32> to vector<8x32xbf16>
    %cst_132 = arith.constant dense<0.000000e+00> : vector<8x128xf32>
    %490 = tpu.matmul %489, %7, %cst_132 {dimension_numbers = #tpu.dot_dimension_numbers<[1], [0], [0], [1], [0, 0, 1, 1], [], []>} : vector<8x32xbf16>, vector<32x128xbf16>, vector<8x128xf32> -> vector<8x128xf32>
    %491 = vector.broadcast %11 : vector<1x128xf32> to vector<8x128xf32>
    %492 = arith.addf %490, %491 : vector<8x128xf32>
    %493 = arith.truncf %457 : vector<8x32xf32> to vector<8x32xbf16>
    %494 = vector.extract_strided_slice %17 {offsets = [56, 0], sizes = [8, 128], strides = [1, 1]} : vector<64x128xf32> to vector<8x128xf32>
    %cst_133 = arith.constant dense<0.000000e+00> : vector<8x128xf32>
    %495 = tpu.matmul %493, %3, %cst_133 {dimension_numbers = #tpu.dot_dimension_numbers<[1], [0], [0], [1], [0, 0, 1, 1], [], []>} : vector<8x32xbf16>, vector<32x128xbf16>, vector<8x128xf32> -> vector<8x128xf32>
    %496 = arith.addf %494, %495 : vector<8x128xf32>
    %497 = arith.negf %496 : vector<8x128xf32>
    %498 = math.exp %497 : vector<8x128xf32>
    %cst_134 = arith.constant 1.000000e+00 : f32
    %499 = vector.broadcast %cst_134 : f32 to vector<8x128xf32>
    %500 = arith.addf %499, %498 : vector<8x128xf32>
    %501 = arith.divf %499, %500 : vector<8x128xf32>
    %502 = vector.extract_strided_slice %501 {offsets = [0, 0], sizes = [8, 32], strides = [1, 1]} : vector<8x128xf32> to vector<8x32xf32>
    %503 = vector.extract_strided_slice %501 {offsets = [0, 32], sizes = [8, 32], strides = [1, 1]} : vector<8x128xf32> to vector<8x32xf32>
    %504 = vector.extract_strided_slice %501 {offsets = [0, 64], sizes = [8, 32], strides = [1, 1]} : vector<8x128xf32> to vector<8x32xf32>
    %cst_135 = arith.constant 2.000000e+00 : f32
    %505 = vector.broadcast %cst_135 : f32 to vector<8x32xf32>
    %506 = arith.mulf %505, %504 : vector<8x32xf32>
    %cst_136 = arith.constant 1.000000e+00 : f32
    %507 = vector.broadcast %cst_136 : f32 to vector<8x32xf32>
    %508 = arith.subf %506, %507 : vector<8x32xf32>
    %509 = vector.extract_strided_slice %501 {offsets = [0, 96], sizes = [8, 32], strides = [1, 1]} : vector<8x128xf32> to vector<8x32xf32>
    %510 = arith.mulf %503, %445 : vector<8x32xf32>
    %511 = arith.mulf %502, %508 : vector<8x32xf32>
    %512 = arith.addf %510, %511 : vector<8x32xf32>
    %cst_137 = arith.constant 2.000000e+00 : f32
    %513 = vector.broadcast %cst_137 : f32 to vector<8x32xf32>
    %514 = arith.mulf %513, %512 : vector<8x32xf32>
    %515 = arith.negf %514 : vector<8x32xf32>
    %516 = math.exp %515 : vector<8x32xf32>
    %cst_138 = arith.constant 1.000000e+00 : f32
    %517 = vector.broadcast %cst_138 : f32 to vector<8x32xf32>
    %518 = arith.addf %517, %516 : vector<8x32xf32>
    %519 = arith.divf %517, %518 : vector<8x32xf32>
    %cst_139 = arith.constant 2.000000e+00 : f32
    %520 = vector.broadcast %cst_139 : f32 to vector<8x32xf32>
    %521 = arith.mulf %520, %519 : vector<8x32xf32>
    %cst_140 = arith.constant 1.000000e+00 : f32
    %522 = vector.broadcast %cst_140 : f32 to vector<8x32xf32>
    %523 = arith.subf %521, %522 : vector<8x32xf32>
    %524 = arith.mulf %509, %523 : vector<8x32xf32>
    %525 = arith.truncf %524 : vector<8x32xf32> to vector<8x32xbf16>
    %cst_141 = arith.constant dense<0.000000e+00> : vector<8x128xf32>
    %526 = tpu.matmul %525, %5, %cst_141 {dimension_numbers = #tpu.dot_dimension_numbers<[1], [0], [0], [1], [0, 0, 1, 1], [], []>} : vector<8x32xbf16>, vector<32x128xbf16>, vector<8x128xf32> -> vector<8x128xf32>
    %527 = arith.addf %526, %492 : vector<8x128xf32>
    %528 = arith.negf %527 : vector<8x128xf32>
    %529 = math.exp %528 : vector<8x128xf32>
    %cst_142 = arith.constant 1.000000e+00 : f32
    %530 = vector.broadcast %cst_142 : f32 to vector<8x128xf32>
    %531 = arith.addf %530, %529 : vector<8x128xf32>
    %532 = arith.divf %530, %531 : vector<8x128xf32>
    %533 = vector.extract_strided_slice %532 {offsets = [0, 0], sizes = [8, 32], strides = [1, 1]} : vector<8x128xf32> to vector<8x32xf32>
    %534 = vector.extract_strided_slice %532 {offsets = [0, 32], sizes = [8, 32], strides = [1, 1]} : vector<8x128xf32> to vector<8x32xf32>
    %535 = vector.extract_strided_slice %532 {offsets = [0, 64], sizes = [8, 32], strides = [1, 1]} : vector<8x128xf32> to vector<8x32xf32>
    %cst_143 = arith.constant 2.000000e+00 : f32
    %536 = vector.broadcast %cst_143 : f32 to vector<8x32xf32>
    %537 = arith.mulf %536, %535 : vector<8x32xf32>
    %cst_144 = arith.constant 1.000000e+00 : f32
    %538 = vector.broadcast %cst_144 : f32 to vector<8x32xf32>
    %539 = arith.subf %537, %538 : vector<8x32xf32>
    %540 = vector.extract_strided_slice %532 {offsets = [0, 96], sizes = [8, 32], strides = [1, 1]} : vector<8x128xf32> to vector<8x32xf32>
    %541 = arith.mulf %534, %476 : vector<8x32xf32>
    %542 = arith.mulf %533, %539 : vector<8x32xf32>
    %543 = arith.addf %541, %542 : vector<8x32xf32>
    %cst_145 = arith.constant 2.000000e+00 : f32
    %544 = vector.broadcast %cst_145 : f32 to vector<8x32xf32>
    %545 = arith.mulf %544, %543 : vector<8x32xf32>
    %546 = arith.negf %545 : vector<8x32xf32>
    %547 = math.exp %546 : vector<8x32xf32>
    %cst_146 = arith.constant 1.000000e+00 : f32
    %548 = vector.broadcast %cst_146 : f32 to vector<8x32xf32>
    %549 = arith.addf %548, %547 : vector<8x32xf32>
    %550 = arith.divf %548, %549 : vector<8x32xf32>
    %cst_147 = arith.constant 2.000000e+00 : f32
    %551 = vector.broadcast %cst_147 : f32 to vector<8x32xf32>
    %552 = arith.mulf %551, %550 : vector<8x32xf32>
    %cst_148 = arith.constant 1.000000e+00 : f32
    %553 = vector.broadcast %cst_148 : f32 to vector<8x32xf32>
    %554 = arith.subf %552, %553 : vector<8x32xf32>
    %555 = arith.mulf %540, %554 : vector<8x32xf32>
    %556 = arith.truncf %555 : vector<8x32xf32> to vector<8x32xbf16>
    %cst_149 = arith.constant dense<0.000000e+00> : vector<8x128xf32>
    %557 = tpu.matmul %556, %9, %cst_149 {dimension_numbers = #tpu.dot_dimension_numbers<[1], [0], [0], [1], [0, 0, 1, 1], [], []>} : vector<8x32xbf16>, vector<32x128xbf16>, vector<8x128xf32> -> vector<8x128xf32>
    %558 = vector.broadcast %12 : vector<1x128xf32> to vector<8x128xf32>
    %559 = arith.addf %557, %558 : vector<8x128xf32>
    %c0_150 = arith.constant 0 : index
    %c0_151 = arith.constant 0 : index
    %560 = vector.load %arg2[%c0_150, %c0_151] : memref<8x128xf32, #tpu.memory_space<vmem>>, vector<8x128xf32>
    tpu.vector_store %arg2[%c0_150, %c0_151], %559 {strides = array<i32>} : memref<8x128xf32, #tpu.memory_space<vmem>>, vector<8x128xf32>,
    return
  }
}

</mosaic_0001>

<bundles_post_ra>
// kernel: lstm_forward.1
= control target key start
LH: loop header
LB: loop body
LE: loop exit
PB: predicated region body
PF: predicated region fallthrough
CT: control target
= control target key end

     0   :  { %vm67_vm0 = vcmask 1043456   ;;  %vm54_vm1 = vcmask 64512   ;;  %v1715_v12 = vmov 0   ;;  %s1716_s25 = smov 64   ;;  %s1717_s26 = smov 32   ;;  %vm102_vm10 = vcmask 261120   ;;  %s2148_s1 = inlined_call_operand.vmem [shape: f32[144,128], index: 1, kind: input, shape index: {}]   ;;  %s2149_s0 = inlined_call_operand.vmem [shape: f32[64,8], index: 0, kind: input, shape index: {}]   ;;  %s2150_s2 = inlined_call_operand.vmem [shape: f32[8,128], index: 2, kind: output, shape index: {}]  }
   0x1   :  { %v16_v0 = vld [vmem:[%s2148_s1 + $0x18] sm:$0xff]  ;;  %v17_v1 = vld [vmem:[%s2148_s1 + $0x20] sm:$0xff]  ;;  %v42_v6 = vld [vmem:[%s2149_s0 + $0x8] sm:$0xff] }
   0x2   :  { %v12_v2 = vld [vmem:[%s2148_s1] sm:$0xff]  ;;  %v1742_v3 = vpack.c.bf16 %v17_v1, %v16_v0  ;;  %v14_v7 = vld [vmem:[%s2148_s1 + $0x8] sm:$0xff]  ;;  %v15_v8 = vld [vmem:[%s2148_s1 + $0x10] sm:$0xff] }
   0x3   :  { %v13_v4 = vpack.c.bf16 %v12_v2, %v12_v2  ;;  %v41_v5 = vld [vmem:[%s2149_s0] sm:$0xff]  ;;  %v1757_v11 = vpack.c.bf16 %v15_v8, %v14_v7  ;;  %v1770_v13 = vld [vmem:[%s2148_s1 + $0x88] ss:$0 sm:$0xff]  ;;  %v22_v55 = vld [vmem:[%s2148_s1 + $0x38] sm:$0xff] }
   0x4   :  { %112 = vmatpush.bf16.msra.mxu1 %v1742_v3  ;;  %v49_v10 = vpack.c.bf16 %v42_v6, %v41_v5  ;;  %v23_v56 = vld [vmem:[%s2148_s1 + $0x40] sm:$0xff]  ;;  %v20_v57 = vld [vmem:[%s2148_s1 + $0x28] sm:$0xff]  ;;  %v21_v59 = vld [vmem:[%s2148_s1 + $0x30] sm:$0xff] }
   0x5   :  { %v69_v9 = vsel %vm67_vm0, %v13_v4, 0  ;;  %v1788_v58 = vpack.c.bf16 %v23_v56, %v22_v55  ;;  %v1794_v60 = vpack.c.bf16 %v21_v59, %v20_v57  ;;  %v1812_v7 = vld [vmem:[%s2148_s1 + $0x89] ss:$0 sm:$0xff] }
   0x6   :  { %78 = vmatpush.bf16.msra.mxu0 %v69_v9 }
   0x7   :  { %192 = vmatpush.bf16.msra.mxu2 %v1788_v58 }
   0x8   :  { %113 = vmatpush.bf16.msra.mxu1 %v1757_v11 }
   0x9   :  { %1488 = vmatmul.msk.bf16.vlgmr.msra.gmra.mxu0 %vm54_vm1, %v49_v10 }
   0xa   :  { %800 = vmatpush.bf16.msrb.mxu0 %v1742_v3 }
   0xb   :  { %114 = vmatmul.bf16.vlgmr.msra.gmra.mxu1 %v1715_v12  ;;  %193 = vmatpush.bf16.msra.mxu2 %v1794_v60 }
   0xc   :  { %284 = vmatpush.bf16.msrb.mxu1 %v1742_v3 }
   0xe   :  { %801 = vmatpush.bf16.msrb.mxu0 %v1757_v11 }
   0xf   :  { %364 = vmatpush.bf16.msrb.mxu2 %v1788_v58 }
  0x10   :  { %285 = vmatpush.bf16.msrb.mxu1 %v1757_v11 }
  0x12   :  { %1052 = vmatpush.bf16.msra.mxu0 %v1788_v58 }
  0x13   :  { %365 = vmatpush.bf16.msrb.mxu2 %v1794_v60 }
  0x14   :  { %456 = vmatpush.bf16.msra.mxu1 %v1742_v3 }
  0x16   :  { %1053 = vmatpush.bf16.msra.mxu0 %v1794_v60 }
  0x18   :  { %457 = vmatpush.bf16.msra.mxu1 %v1757_v11 }
  0x86   :  { %v80_v14 = vpop.f32.mrf.mxu0 }
  0x87   :  { %v81_v15 = vadd.f32 %v1770_v13, %v80_v14 }
  0x88   :  { %v115_v16 = vpop.f32.mrf.mxu1 }
  0x89   :  { %v119_v17 = vadd.f32 %v115_v16, %v81_v15 }
  0x8b   :  { %v1492_v18 = vmul.f32 -1.442695, %v119_v17 }
  0x8d   :  { %1585 = vpow2.f32 %v1492_v18 }
  0x8e   :  { %v82_v1 = vpop.f32.mrf.mxu0 }
  0x8f   :  { %v83_v2 = vadd.f32 %v1770_v13, %v82_v1 }
  0x90   :  { %v117_v19 = vpop.f32.mrf.mxu1 }
  0x93   :  { %v1586_v20 = vpop.eup %1585 }
  0x94   :  { %v123_v21 = vadd.f32 1.0, %v1586_v20 }
  0x96   :  { %1587 = vrcp.f32 %v123_v21  ;;  %v135_v25 = vand.u32 2147483648, %v123_v21  ;;  %v133_v27 = vand.u32 2147483647, %v123_v21  ;;  %vm129_vm3 = vweird.f32 %v123_v21 }
  0x98   :  { %v136_v29 = vor.u32 1.1754944e-38, %v135_v25  ;;  %vm134_vm5 = vcmp.eq.f32.partialorder %v133_v27, 8.507059e+37 }
  0x9c   :  { %v1588_v22 = vpop.eup %1587 }
  0x9d   :  { %v125_v23 = vmul.f32 %v1588_v22, %v123_v21  ;;  %vm130_vm2 = vweird.f32 %v1588_v22 }
  0x9e   :  { %vm131_vm4 = vmor %vm129_vm3, %vm130_vm2 }
  0x9f   :  { %v126_v24 = vsub.f32 1.0, %v125_v23 }
  0xa1   :  { %v127_v26 = vmul.f32 %v1588_v22, %v126_v24 }
  0xa3   :  { %v128_v28 = vadd.f32 %v1588_v22, %v127_v26 }
  0xa5   :  { %v132_v30 = vsel %vm131_vm4, %v1588_v22, %v128_v28 }
  0xa6   :  { %v137_v31 = vsel %vm134_vm5, %v136_v29, %v132_v30 }
  0xa7   :  { %v139_v32 = vmul.f32 2.0, %v137_v31  ;;  %v141_v36 = vmul.f32 0.0, %v137_v31 }
  0xa9   :  { %v1493_v33 = vadd.f32 -1.0, %v139_v32 }
  0xab   :  { %143 = vrot.lane.b32.xlu0 %v1493_v33, %s1716_s25 }
 0x11d   :  { %v144_v34 = vpop.permute.xlu0 %143 }
 0x11e   :  { %v146_v35 = vmul.f32 %v144_v34, %v137_v31 }
 0x120   :  { %148 = vrot.lane.b32.xlu0 %v146_v35, %s1717_s26 }
 0x192   :  { %v149_v37 = vpop.permute.xlu0 %148 }
 0x193   :  { %v1775_v38 = vadd.f32 %v149_v37, %v141_v36 }
 0x195   :  { %v1494_v39 = vmul.f32 -2.0, %v1775_v38 }
 0x197   :  { %v154_v40 = vmul.f32 1.442695, %v1494_v39 }
 0x199   :  { %1589 = vpow2.f32 %v154_v40 }
 0x19f   :  { %v1590_v41 = vpop.eup %1589 }
 0x1a0   :  { %v156_v42 = vadd.f32 1.0, %v1590_v41 }
 0x1a2   :  { %1591 = vrcp.f32 %v156_v42  ;;  %v168_v46 = vand.u32 2147483648, %v156_v42  ;;  %v166_v48 = vand.u32 2147483647, %v156_v42  ;;  %vm162_vm7 = vweird.f32 %v156_v42 }
 0x1a4   :  { %v169_v50 = vor.u32 1.1754944e-38, %v168_v46  ;;  %vm167_vm9 = vcmp.eq.f32.partialorder %v166_v48, 8.507059e+37 }
 0x1a8   :  { %v1592_v43 = vpop.eup %1591 }
 0x1a9   :  { %v158_v44 = vmul.f32 %v1592_v43, %v156_v42  ;;  %vm163_vm6 = vweird.f32 %v1592_v43 }
 0x1aa   :  { %vm164_vm8 = vmor %vm162_vm7, %vm163_vm6 }
 0x1ab   :  { %v159_v45 = vsub.f32 1.0, %v158_v44 }
 0x1ad   :  { %v160_v47 = vmul.f32 %v1592_v43, %v159_v45 }
 0x1af   :  { %v161_v49 = vadd.f32 %v1592_v43, %v160_v47 }
 0x1b1   :  { %v165_v51 = vsel %vm164_vm8, %v1592_v43, %v161_v49 }
 0x1b2   :  { %v170_v52 = vsel %vm167_vm9, %v169_v50, %v165_v51 }
 0x1b3   :  { %v172_v53 = vmul.f32 2.0, %v170_v52 }
 0x1b5   :  { %v1495_v54 = vadd.f32 -1.0, %v172_v53 }
 0x1b7   :  { %175 = vrot.lane.b32.xlu1 %v1495_v54, %s1716_s25 }
 0x229   :  { %v176_v61 = vpop.permute.xlu1 %175 }
 0x22a   :  { %v178_v62 = vmul.f32 %v176_v61, %v137_v31 }
 0x22c   :  { %v179_v63 = vpack.c.bf16 %v178_v62, %v178_v62 }
 0x22e   :  { %181 = vrot.lane.b32.xlu1 %v179_v63, %s1717_s26 }
 0x2a0   :  { %v182_v0 = vpop.permute.xlu1 %181 }
 0x2a1   :  { %1496 = vmatmul.msk.bf16.vlgmr.msra.gmra.mxu2 %vm102_vm10, %v182_v0  ;;  %1502 = vmatmul.msk.bf16.vlgmr.msrb.gmra.mxu1 %vm102_vm10, %v182_v0 }
 0x2a2   :  { %628 = vmatpush.bf16.msrb.mxu1 %v1742_v3  ;;  %536 = vmatpush.bf16.msra.mxu2 %v1788_v58 }
 0x2a6   :  { %629 = vmatpush.bf16.msrb.mxu1 %v1757_v11  ;;  %537 = vmatpush.bf16.msra.mxu2 %v1794_v60 }
 0x31e   :  { %v287_v4 = vpop.f32.mrf.mxu1 }
 0x31f   :  { %v291_v5 = vadd.f32 %v287_v4, %v83_v2 }
 0x321   :  { %v1503_v6 = vmul.f32 -1.442695, %v291_v5 }
 0x323   :  { %1593 = vpow2.f32 %v1503_v6 }
 0x324   :  { %v195_v8 = vpop.f32.mrf.mxu2 }
 0x325   :  { %v196_v9 = vadd.f32 %v1812_v7, %v195_v8 }
 0x326   :  { %v289_v10 = vpop.f32.mrf.mxu1 }
 0x327   :  { %v1497_v12 = vmul.f32 -1.442695, %v196_v9 }
 0x329   :  { %v1594_v14 = vpop.eup %1593  ;;  %1595 = vpow2.f32 %v1497_v12 }
 0x32a   :  { %v295_v15 = vadd.f32 1.0, %v1594_v14 }
 0x32c   :  { %1597 = vrcp.f32 %v295_v15  ;;  %v197_v16 = vpop.f32.mrf.mxu2  ;;  %v307_v32 = vand.u32 2147483648, %v295_v15  ;;  %vm301_vm0 = vweird.f32 %v295_v15  ;;  %v305_v34 = vand.u32 2147483647, %v295_v15 }
 0x32e   :  { %v308_v39 = vor.u32 1.1754944e-38, %v307_v32  ;;  %vm306_vm3 = vcmp.eq.f32.partialorder %v305_v34, 8.507059e+37  ;;  %v26_v32 = vld [vmem:[%s2148_s1 + $0x48] sm:$0xff]  ;;  %v27_v34 = vld [vmem:[%s2148_s1 + $0x50] sm:$0xff] }
 0x32f   :  { %v1596_v17 = vpop.eup %1595 }
 0x330   :  { %v202_v18 = vadd.f32 1.0, %v1596_v17 }
 0x332   :  { %v1598_v19 = vpop.eup %1597  ;;  %1599 = vrcp.f32 %v202_v18  ;;  %v214_v26 = vand.u32 2147483648, %v202_v18  ;;  %v212_v28 = vand.u32 2147483647, %v202_v18  ;;  %vm208_vm12 = vweird.f32 %v202_v18 }
 0x333   :  { %v297_v20 = vmul.f32 %v1598_v19, %v295_v15  ;;  %vm302_vm13 = vweird.f32 %v1598_v19 }
 0x334   :  { %v215_v31 = vor.u32 1.1754944e-38, %v214_v26  ;;  %vm213_vm15 = vcmp.eq.f32.partialorder %v212_v28, 8.507059e+37  ;;  %vm303_vm2 = vmor %vm301_vm0, %vm302_vm13 }
 0x335   :  { %v298_v21 = vsub.f32 1.0, %v297_v20 }
 0x337   :  { %v299_v25 = vmul.f32 %v1598_v19, %v298_v21 }
 0x338   :  { %v1600_v22 = vpop.eup %1599 }
 0x339   :  { %v204_v23 = vmul.f32 %v1600_v22, %v202_v18  ;;  %vm209_vm11 = vweird.f32 %v1600_v22  ;;  %v300_v30 = vadd.f32 %v1598_v19, %v299_v25 }
 0x33a   :  { %vm210_vm14 = vmor %vm208_vm12, %vm209_vm11 }
 0x33b   :  { %v205_v24 = vsub.f32 1.0, %v204_v23  ;;  %v304_v37 = vsel %vm303_vm2, %v1598_v19, %v300_v30  ;;  %v28_v30 = vld [vmem:[%s2148_s1 + $0x58] sm:$0xff] }
 0x33c   :  { %v1818_v41 = vsel %vm306_vm3, %v308_v39, %v304_v37  ;;  %v1861_v39 = vpack.c.bf16 %v27_v34, %v26_v32 }
 0x33d   :  { %v206_v27 = vmul.f32 %v1600_v22, %v205_v24  ;;  %v311_v42 = vmul.f32 2.0, %v1818_v41  ;;  %v313_v53 = vmul.f32 %v1818_v41, %v1775_v38 }
 0x33f   :  { %v207_v29 = vadd.f32 %v1600_v22, %v206_v27  ;;  %v1504_v43 = vadd.f32 -1.0, %v311_v42 }
 0x341   :  { %v211_v33 = vsel %vm210_vm14, %v1600_v22, %v207_v29 }
 0x342   :  { %v1815_v35 = vsel %vm213_vm15, %v215_v31, %v211_v33  ;;  %v29_v31 = vld [vmem:[%s2148_s1 + $0x60] sm:$0xff] }
 0x343   :  { %v218_v36 = vmul.f32 2.0, %v1815_v35  ;;  %v220_v48 = vmul.f32 0.0, %v1815_v35  ;;  %v1849_v33 = vpack.c.bf16 %v29_v31, %v28_v30 }
 0x345   :  { %v1498_v40 = vadd.f32 -1.0, %v218_v36  ;;  %v44_v36 = vld [vmem:[%s2149_s0 + $0x18] sm:$0xff]  ;;  %271 = vmatpush.bf16.msra.mxu3 %v1849_v33 }
 0x347   :  { %222 = vrot.lane.b32.xlu2 %v1498_v40, %s1716_s25 }
 0x349   :  { %272 = vmatpush.bf16.msra.mxu3 %v1861_v39 }
 0x34d   :  { %443 = vmatpush.bf16.msrb.mxu3 %v1849_v33 }
 0x34f   :  { %315 = vrot.lane.b32.xlu2 %v1504_v43, %s1716_s25 }
 0x351   :  { %444 = vmatpush.bf16.msrb.mxu3 %v1861_v39 }
 0x3a1   :  { %v223_v44 = vpop.permute.xlu2 %222 }
 0x3a2   :  { %v225_v45 = vmul.f32 %v223_v44, %v1815_v35 }
 0x3a4   :  { %227 = vrot.lane.b32.xlu0 %v225_v45, %s1717_s26 }
 0x3a9   :  { %v316_v46 = vpop.permute.xlu2 %315 }
 0x3aa   :  { %v318_v47 = vmul.f32 %v316_v46, %v1818_v41 }
 0x3ac   :  { %320 = vrot.lane.b32.xlu1 %v318_v47, %s1717_s26 }
 0x416   :  { %v228_v49 = vpop.permute.xlu0 %227 }
 0x417   :  { %v1828_v50 = vadd.f32 %v228_v49, %v220_v48 }
 0x419   :  { %v1499_v51 = vmul.f32 -2.0, %v1828_v50 }
 0x41b   :  { %v233_v52 = vmul.f32 1.442695, %v1499_v51 }
 0x41d   :  { %1601 = vpow2.f32 %v233_v52 }
 0x41e   :  { %v321_v54 = vpop.permute.xlu1 %320 }
 0x41f   :  { %v1833_v55 = vadd.f32 %v321_v54, %v313_v53 }
 0x421   :  { %v1505_v56 = vmul.f32 -2.0, %v1833_v55 }
 0x423   :  { %v1602_v57 = vpop.eup %1601  ;;  %v326_v59 = vmul.f32 1.442695, %v1505_v56 }
 0x424   :  { %v235_v61 = vadd.f32 1.0, %v1602_v57 }
 0x425   :  { %1603 = vpow2.f32 %v326_v59 }
 0x426   :  { %1605 = vrcp.f32 %v235_v61  ;;  %v247_v4 = vand.u32 2147483648, %v235_v61  ;;  %v245_v38 = vand.u32 2147483647, %v235_v61  ;;  %vm241_vm5 = vweird.f32 %v235_v61 }
 0x428   :  { %v248_v9 = vor.u32 1.1754944e-38, %v247_v4  ;;  %vm246_vm7 = vcmp.eq.f32.partialorder %v245_v38, 8.507059e+37 }
 0x42b   :  { %v1604_v62 = vpop.eup %1603 }
 0x42c   :  { %v1606_v63 = vpop.eup %1605  ;;  %v328_v0 = vadd.f32 1.0, %v1604_v62 }
 0x42d   :  { %v237_v1 = vmul.f32 %v1606_v63, %v235_v61  ;;  %vm242_vm4 = vweird.f32 %v1606_v63 }
 0x42e   :  { %1607 = vrcp.f32 %v328_v0  ;;  %vm243_vm6 = vmor %vm241_vm5, %vm242_vm4  ;;  %v340_v17 = vand.u32 2147483648, %v328_v0  ;;  %v338_v20 = vand.u32 2147483647, %v328_v0  ;;  %vm334_vm9 = vweird.f32 %v328_v0 }
 0x42f   :  { %v238_v2 = vsub.f32 1.0, %v237_v1 }
 0x430   :  { %v341_v22 = vor.u32 1.1754944e-38, %v340_v17  ;;  %vm339_vm12 = vcmp.eq.f32.partialorder %v338_v20, 8.507059e+37 }
 0x431   :  { %v239_v5 = vmul.f32 %v1606_v63, %v238_v2 }
 0x433   :  { %v240_v6 = vadd.f32 %v1606_v63, %v239_v5 }
 0x434   :  { %v1608_v8 = vpop.eup %1607 }
 0x435   :  { %v244_v10 = vsel %vm243_vm6, %v1606_v63, %v240_v6  ;;  %v330_v12 = vmul.f32 %v1608_v8, %v328_v0  ;;  %vm335_vm8 = vweird.f32 %v1608_v8 }
 0x436   :  { %v249_v14 = vsel %vm246_vm7, %v248_v9, %v244_v10  ;;  %vm336_vm11 = vmor %vm334_vm9, %vm335_vm8 }
 0x437   :  { %v251_v15 = vmul.f32 2.0, %v249_v14  ;;  %v331_v16 = vsub.f32 1.0, %v330_v12 }
 0x439   :  { %v1500_v18 = vadd.f32 -1.0, %v251_v15  ;;  %v332_v19 = vmul.f32 %v1608_v8, %v331_v16 }
 0x43b   :  { %254 = vrot.lane.b32.xlu2 %v1500_v18, %s1716_s25  ;;  %v333_v21 = vadd.f32 %v1608_v8, %v332_v19 }
 0x43d   :  { %v337_v23 = vsel %vm336_vm11, %v1608_v8, %v333_v21 }
 0x43e   :  { %v342_v24 = vsel %vm339_vm12, %v341_v22, %v337_v23 }
 0x43f   :  { %v344_v25 = vmul.f32 2.0, %v342_v24 }
 0x441   :  { %v1506_v26 = vadd.f32 -1.0, %v344_v25 }
 0x443   :  { %347 = vrot.lane.b32.xlu0 %v1506_v26, %s1716_s25 }
 0x495   :  { %v255_v27 = vpop.permute.xlu2 %254 }
 0x496   :  { %v257_v28 = vmul.f32 %v255_v27, %v1815_v35  ;;  %v43_v35 = vld [vmem:[%s2149_s0 + $0x10] sm:$0xff] }
 0x497   :  { %v50_v37 = vpack.c.bf16 %v44_v36, %v43_v35 }
 0x498   :  { %v258_v29 = vpack.c.bf16 %v257_v28, %v257_v28 }
 0x499   :  { %1489 = vmatmul.msk.bf16.gmra.mxu0 %vm54_vm1, %v50_v37 }
 0x49a   :  { %260 = vrot.lane.b32.xlu1 %v258_v29, %s1717_s26 }
 0x4b5   :  { %v348_v40 = vpop.permute.xlu0 %347 }
 0x4b6   :  { %v350_v42 = vmul.f32 %v348_v40, %v1818_v41 }
 0x4b8   :  { %v351_v43 = vpack.c.bf16 %v350_v42, %v350_v42 }
 0x4ba   :  { %353 = vrot.lane.b32.xlu2 %v351_v43, %s1717_s26 }
 0x50c   :  { %v261_v44 = vpop.permute.xlu1 %260 }
 0x50d   :  { %1501 = vmatmul.msk.bf16.vlgmr.msra.gmra.mxu3 %vm102_vm10, %v261_v44 }
 0x50e   :  { %615 = vmatpush.bf16.msra.mxu3 %v1849_v33 }
 0x512   :  { %616 = vmatpush.bf16.msra.mxu3 %v1861_v39 }
 0x514   :  { %v354_v45 = vpop.permute.xlu2 %353 }
 0x515   :  { %1507 = vmatmul.msk.bf16.vlgmr.msrb.gmra.mxu2 %vm102_vm10, %v354_v45  ;;  %1513 = vmatmul.msk.bf16.vlgmr.msra.gmra.mxu1 %vm102_vm10, %v354_v45 }
 0x516   :  { %708 = vmatpush.bf16.msrb.mxu2 %v1788_v58  ;;  %880 = vmatpush.bf16.msra.mxu1 %v1788_v58  ;;  %v85_v41 = vpop.f32.mrf.mxu0 }
 0x517   :  { %v86_v46 = vadd.f32 %v1770_v13, %v85_v41 }
 0x51a   :  { %709 = vmatpush.bf16.msrb.mxu2 %v1794_v60  ;;  %881 = vmatpush.bf16.msra.mxu1 %v1794_v60 }
 0x590   :  { %v274_v47 = vpop.f32.mrf.mxu3 }
 0x591   :  { %v275_v52 = vadd.f32 %v1812_v7, %v274_v47 }
 0x592   :  { %v459_v48 = vpop.f32.mrf.mxu1 }
 0x593   :  { %v463_v49 = vadd.f32 %v459_v48, %v86_v46 }
 0x595   :  { %v1514_v51 = vmul.f32 -1.442695, %v463_v49 }
 0x597   :  { %1609 = vpow2.f32 %v1514_v51 }
 0x598   :  { %v276_v53 = vpop.f32.mrf.mxu3  ;;  %v367_v54 = vpop.f32.mrf.mxu2 }
 0x599   :  { %v368_v56 = vadd.f32 %v367_v54, %v275_v52 }
 0x59a   :  { %v461_v57 = vpop.f32.mrf.mxu1 }
 0x59b   :  { %v1508_v59 = vmul.f32 -1.442695, %v368_v56 }
 0x59d   :  { %v1610_v61 = vpop.eup %1609  ;;  %1611 = vpow2.f32 %v1508_v59 }
 0x59e   :  { %v467_v62 = vadd.f32 1.0, %v1610_v61 }
 0x5a0   :  { %1613 = vrcp.f32 %v467_v62  ;;  %v369_v63 = vpop.f32.mrf.mxu2  ;;  %v479_v38 = vand.u32 2147483648, %v467_v62  ;;  %v477_v8 = vand.u32 2147483647, %v467_v62  ;;  %vm473_vm14 = vweird.f32 %v467_v62 }
 0x5a2   :  { %v480_v14 = vor.u32 1.1754944e-38, %v479_v38  ;;  %vm478_vm0 = vcmp.eq.f32.partialorder %v477_v8, 8.507059e+37 }
 0x5a3   :  { %v1612_v0 = vpop.eup %1611 }
 0x5a4   :  { %v374_v1 = vadd.f32 1.0, %v1612_v0 }
 0x5a6   :  { %v1614_v2 = vpop.eup %1613  ;;  %1615 = vrcp.f32 %v374_v1  ;;  %v386_v18 = vand.u32 2147483648, %v374_v1  ;;  %v384_v21 = vand.u32 2147483647, %v374_v1  ;;  %vm380_vm3 = vweird.f32 %v374_v1 }
 0x5a7   :  { %v469_v4 = vmul.f32 %v1614_v2, %v467_v62  ;;  %vm474_vm13 = vweird.f32 %v1614_v2 }
 0x5a8   :  { %vm475_vm15 = vmor %vm473_vm14, %vm474_vm13  ;;  %v387_v24 = vor.u32 1.1754944e-38, %v386_v18  ;;  %vm385_vm5 = vcmp.eq.f32.partialorder %v384_v21, 8.507059e+37 }
 0x5a9   :  { %v470_v5 = vsub.f32 1.0, %v469_v4 }
 0x5ab   :  { %v471_v6 = vmul.f32 %v1614_v2, %v470_v5 }
 0x5ac   :  { %v1616_v9 = vpop.eup %1615 }
 0x5ad   :  { %v376_v10 = vmul.f32 %v1616_v9, %v374_v1  ;;  %v472_v12 = vadd.f32 %v1614_v2, %v471_v6  ;;  %vm381_vm2 = vweird.f32 %v1616_v9 }
 0x5ae   :  { %vm382_vm4 = vmor %vm380_vm3, %vm381_vm2 }
 0x5af   :  { %v377_v15 = vsub.f32 1.0, %v376_v10  ;;  %v476_v16 = vsel %vm475_vm15, %v1614_v2, %v472_v12 }
 0x5b0   :  { %v1880_v17 = vsel %vm478_vm0, %v480_v14, %v476_v16 }
 0x5b1   :  { %v483_v19 = vmul.f32 2.0, %v1880_v17  ;;  %v378_v20 = vmul.f32 %v1616_v9, %v377_v15  ;;  %v485_v44 = vmul.f32 %v1880_v17, %v1833_v55 }
 0x5b3   :  { %v1515_v22 = vadd.f32 -1.0, %v483_v19  ;;  %v379_v23 = vadd.f32 %v1616_v9, %v378_v20 }
 0x5b5   :  { %487 = vrot.lane.b32.xlu1 %v1515_v22, %s1716_s25  ;;  %v383_v25 = vsel %vm382_vm4, %v1616_v9, %v379_v23 }
 0x5b6   :  { %v1884_v26 = vsel %vm385_vm5, %v387_v24, %v383_v25 }
 0x5b7   :  { %v390_v27 = vmul.f32 2.0, %v1884_v26  ;;  %v392_v34 = vmul.f32 %v1884_v26, %v1828_v50 }
 0x5b9   :  { %v1509_v28 = vadd.f32 -1.0, %v390_v27 }
 0x5bb   :  { %394 = vrot.lane.b32.xlu0 %v1509_v28, %s1716_s25 }
 0x627   :  { %v488_v29 = vpop.permute.xlu1 %487 }
 0x628   :  { %v490_v30 = vmul.f32 %v488_v29, %v1880_v17 }
 0x62a   :  { %492 = vrot.lane.b32.xlu0 %v490_v30, %s1717_s26 }
 0x62d   :  { %v395_v31 = vpop.permute.xlu0 %394 }
 0x62e   :  { %v397_v32 = vmul.f32 %v395_v31, %v1884_v26 }
 0x630   :  { %399 = vrot.lane.b32.xlu2 %v397_v32, %s1717_s26 }
 0x68a   :  { %v400_v35 = vpop.permute.xlu2 %399 }
 0x68b   :  { %v1894_v36 = vadd.f32 %v400_v35, %v392_v34 }
 0x68d   :  { %v1510_v37 = vmul.f32 -2.0, %v1894_v36 }
 0x68f   :  { %v405_v40 = vmul.f32 1.442695, %v1510_v37 }
 0x691   :  { %1617 = vpow2.f32 %v405_v40 }
 0x697   :  { %v1618_v42 = vpop.eup %1617 }
 0x698   :  { %v407_v43 = vadd.f32 1.0, %v1618_v42 }
 0x69a   :  { %1619 = vrcp.f32 %v407_v43  ;;  %v419_v51 = vand.u32 2147483648, %v407_v43  ;;  %v417_v53 = vand.u32 2147483647, %v407_v43  ;;  %vm413_vm7 = vweird.f32 %v407_v43 }
 0x69c   :  { %v493_v45 = vpop.permute.xlu0 %492  ;;  %v420_v56 = vor.u32 1.1754944e-38, %v419_v51  ;;  %vm418_vm9 = vcmp.eq.f32.partialorder %v417_v53, 8.507059e+37 }
 0x69d   :  { %v1899_v41 = vadd.f32 %v493_v45, %v485_v44 }
 0x69f   :  { %v1516_v46 = vmul.f32 -2.0, %v1899_v41 }
 0x6a0   :  { %v1620_v47 = vpop.eup %1619 }
 0x6a1   :  { %v498_v50 = vmul.f32 1.442695, %v1516_v46  ;;  %v409_v48 = vmul.f32 %v1620_v47, %v407_v43  ;;  %vm414_vm6 = vweird.f32 %v1620_v47 }
 0x6a2   :  { %vm415_vm8 = vmor %vm413_vm7, %vm414_vm6 }
 0x6a3   :  { %1621 = vpow2.f32 %v498_v50  ;;  %v410_v49 = vsub.f32 1.0, %v409_v48 }
 0x6a5   :  { %v411_v52 = vmul.f32 %v1620_v47, %v410_v49 }
 0x6a7   :  { %v412_v54 = vadd.f32 %v1620_v47, %v411_v52 }
 0x6a9   :  { %v1622_v57 = vpop.eup %1621  ;;  %v416_v55 = vsel %vm415_vm8, %v1620_v47, %v412_v54 }
 0x6aa   :  { %v500_v59 = vadd.f32 1.0, %v1622_v57  ;;  %v421_v61 = vsel %vm418_vm9, %v420_v56, %v416_v55 }
 0x6ab   :  { %v423_v62 = vmul.f32 2.0, %v421_v61 }
 0x6ac   :  { %1623 = vrcp.f32 %v500_v59  ;;  %v512_v4 = vand.u32 2147483648, %v500_v59  ;;  %v510_v38 = vand.u32 2147483647, %v500_v59  ;;  %vm506_vm12 = vweird.f32 %v500_v59 }
 0x6ad   :  { %v1511_v63 = vadd.f32 -1.0, %v423_v62 }
 0x6ae   :  { %v513_v8 = vor.u32 1.1754944e-38, %v512_v4  ;;  %vm511_vm14 = vcmp.eq.f32.partialorder %v510_v38, 8.507059e+37 }
 0x6af   :  { %426 = vrot.lane.b32.xlu1 %v1511_v63, %s1716_s25 }
 0x6b2   :  { %v1624_v0 = vpop.eup %1623 }
 0x6b3   :  { %v502_v1 = vmul.f32 %v1624_v0, %v500_v59  ;;  %vm507_vm11 = vweird.f32 %v1624_v0 }
 0x6b4   :  { %vm508_vm13 = vmor %vm506_vm12, %vm507_vm11 }
 0x6b5   :  { %v503_v2 = vsub.f32 1.0, %v502_v1 }
 0x6b7   :  { %v504_v5 = vmul.f32 %v1624_v0, %v503_v2 }
 0x6b9   :  { %v505_v6 = vadd.f32 %v1624_v0, %v504_v5 }
 0x6bb   :  { %v509_v9 = vsel %vm508_vm13, %v1624_v0, %v505_v6 }
 0x6bc   :  { %v514_v10 = vsel %vm511_vm14, %v513_v8, %v509_v9 }
 0x6bd   :  { %v516_v12 = vmul.f32 2.0, %v514_v10 }
 0x6bf   :  { %v1517_v14 = vadd.f32 -1.0, %v516_v12 }
 0x6c1   :  { %519 = vrot.lane.b32.xlu2 %v1517_v14, %s1716_s25 }
 0x71b   :  { %v520_v15 = vpop.permute.xlu2 %519 }
 0x71c   :  { %v522_v16 = vmul.f32 %v520_v15, %v1880_v17  ;;  %v87_v17 = vpop.f32.mrf.mxu0 }
 0x71d   :  { %v88_v24 = vadd.f32 %v1770_v13, %v87_v17 }
 0x71e   :  { %v523_v18 = vpack.c.bf16 %v522_v16, %v522_v16 }
 0x720   :  { %525 = vrot.lane.b32.xlu1 %v523_v18, %s1717_s26 }
 0x721   :  { %v427_v19 = vpop.permute.xlu1 %426 }
 0x722   :  { %v429_v20 = vmul.f32 %v427_v19, %v1884_v26 }
 0x724   :  { %v430_v21 = vpack.c.bf16 %v429_v20, %v429_v20 }
 0x726   :  { %432 = vrot.lane.b32.xlu0 %v430_v21, %s1717_s26 }
 0x792   :  { %v526_v22 = vpop.permute.xlu1 %525 }
 0x793   :  { %1518 = vmatmul.msk.bf16.vlgmr.msra.gmra.mxu2 %vm102_vm10, %v526_v22  ;;  %1524 = vmatmul.msk.bf16.vlgmr.msrb.gmra.mxu1 %vm102_vm10, %v526_v22 }
 0x794   :  { %959 = vmatpush.bf16.msra.mxu2 %v1849_v33  ;;  %1131 = vmatpush.bf16.msrb.mxu1 %v1849_v33 }
 0x798   :  { %v433_v23 = vpop.permute.xlu0 %432  ;;  %960 = vmatpush.bf16.msra.mxu2 %v1861_v39  ;;  %1132 = vmatpush.bf16.msrb.mxu1 %v1861_v39 }
 0x799   :  { %1512 = vmatmul.msk.bf16.vlgmr.msrb.gmra.mxu3 %vm102_vm10, %v433_v23 }
 0x79a   :  { %787 = vmatpush.bf16.msrb.mxu3 %v1849_v33 }
 0x79e   :  { %788 = vmatpush.bf16.msrb.mxu3 %v1861_v39 }
 0x810   :  { %v631_v25 = vpop.f32.mrf.mxu1 }
 0x811   :  { %v635_v26 = vadd.f32 %v631_v25, %v88_v24 }
 0x813   :  { %v1525_v27 = vmul.f32 -1.442695, %v635_v26 }
 0x815   :  { %1625 = vpow2.f32 %v1525_v27 }
 0x816   :  { %v539_v28 = vpop.f32.mrf.mxu2 }
 0x818   :  { %v633_v29 = vpop.f32.mrf.mxu1 }
 0x81b   :  { %v1626_v30 = vpop.eup %1625 }
 0x81c   :  { %v639_v31 = vadd.f32 1.0, %v1626_v30  ;;  %v446_v32 = vpop.f32.mrf.mxu3 }
 0x81d   :  { %v447_v34 = vadd.f32 %v1812_v7, %v446_v32 }
 0x81e   :  { %1627 = vrcp.f32 %v639_v31  ;;  %v541_v35 = vpop.f32.mrf.mxu2  ;;  %v651_v46 = vand.u32 2147483648, %v639_v31  ;;  %v649_v48 = vand.u32 2147483647, %v639_v31  ;;  %vm645_vm0 = vweird.f32 %v639_v31 }
 0x81f   :  { %v540_v37 = vadd.f32 %v539_v28, %v447_v34 }
 0x820   :  { %v652_v52 = vor.u32 1.1754944e-38, %v651_v46  ;;  %vm650_vm3 = vcmp.eq.f32.partialorder %v649_v48, 8.507059e+37 }
 0x821   :  { %v1519_v40 = vmul.f32 -1.442695, %v540_v37 }
 0x823   :  { %1629 = vpow2.f32 %v1519_v40 }
 0x824   :  { %v1628_v42 = vpop.eup %1627  ;;  %v448_v43 = vpop.f32.mrf.mxu3 }
 0x825   :  { %v641_v44 = vmul.f32 %v1628_v42, %v639_v31  ;;  %vm646_vm15 = vweird.f32 %v1628_v42 }
 0x826   :  { %vm647_vm2 = vmor %vm645_vm0, %vm646_vm15 }
 0x827   :  { %v642_v45 = vsub.f32 1.0, %v641_v44 }
 0x829   :  { %v1630_v47 = vpop.eup %1629  ;;  %v643_v50 = vmul.f32 %v1628_v42, %v642_v45 }
 0x82a   :  { %v546_v49 = vadd.f32 1.0, %v1630_v47 }
 0x82b   :  { %v644_v51 = vadd.f32 %v1628_v42, %v643_v50 }
 0x82c   :  { %1631 = vrcp.f32 %v546_v49  ;;  %v558_v62 = vand.u32 2147483648, %v546_v49  ;;  %v556_v0 = vand.u32 2147483647, %v546_v49  ;;  %vm552_vm5 = vweird.f32 %v546_v49 }
 0x82d   :  { %v648_v53 = vsel %vm647_vm2, %v1628_v42, %v644_v51 }
 0x82e   :  { %v1919_v54 = vsel %vm650_vm3, %v652_v52, %v648_v53  ;;  %v559_v2 = vor.u32 1.1754944e-38, %v558_v62  ;;  %vm557_vm7 = vcmp.eq.f32.partialorder %v556_v0, 8.507059e+37  ;;  %v48_v62 = vld [vmem:[%s2149_s0 + $0x38] sm:$0xff] }
 0x82f   :  { %v655_v56 = vmul.f32 2.0, %v1919_v54  ;;  %v657_v14 = vmul.f32 %v1919_v54, %v1899_v41 }
 0x831   :  { %v1526_v57 = vadd.f32 -1.0, %v655_v56 }
 0x832   :  { %v1632_v55 = vpop.eup %1631 }
 0x833   :  { %v548_v59 = vmul.f32 %v1632_v55, %v546_v49  ;;  %659 = vrot.lane.b32.xlu0 %v1526_v57, %s1716_s25  ;;  %vm553_vm4 = vweird.f32 %v1632_v55  ;;  %v45_v57 = vld [vmem:[%s2149_s0 + $0x20] sm:$0xff] }
 0x834   :  { %vm554_vm6 = vmor %vm552_vm5, %vm553_vm4 }
 0x835   :  { %v549_v61 = vsub.f32 1.0, %v548_v59 }
 0x837   :  { %v550_v63 = vmul.f32 %v1632_v55, %v549_v61  ;;  %v47_v61 = vld [vmem:[%s2149_s0 + $0x30] sm:$0xff] }
 0x839   :  { %v551_v1 = vadd.f32 %v1632_v55, %v550_v63 }
 0x83b   :  { %v555_v4 = vsel %vm554_vm6, %v1632_v55, %v551_v1  ;;  %v46_v55 = vld [vmem:[%s2149_s0 + $0x28] sm:$0xff]  ;;  %v52_v1 = vpack.c.bf16 %v48_v62, %v47_v61 }
 0x83c   :  { %v1923_v5 = vsel %vm557_vm7, %v559_v2, %v555_v4  ;;  %v51_v59 = vpack.c.bf16 %v46_v55, %v45_v57 }
 0x83d   :  { %v562_v38 = vmul.f32 2.0, %v1923_v5  ;;  %v564_v21 = vmul.f32 %v1923_v5, %v1894_v36 }
 0x83e   :  { %1490 = vmatmul.msk.bf16.gmra.mxu0 %vm54_vm1, %v51_v59 }
 0x83f   :  { %v1520_v6 = vadd.f32 -1.0, %v562_v38 }
 0x841   :  { %566 = vrot.lane.b32.xlu2 %v1520_v6, %s1716_s25 }
 0x84e   :  { %1491 = vmatmul.msk.bf16.gmra.mxu0 %vm54_vm1, %v52_v1 }
 0x89b   :  { %v567_v8 = vpop.permute.xlu2 %566 }
 0x89c   :  { %v569_v9 = vmul.f32 %v567_v8, %v1923_v5 }
 0x89e   :  { %571 = vrot.lane.b32.xlu1 %v569_v9, %s1717_s26 }
 0x8a5   :  { %v660_v10 = vpop.permute.xlu0 %659 }
 0x8a6   :  { %v662_v12 = vmul.f32 %v660_v10, %v1919_v54 }
 0x8a8   :  { %664 = vrot.lane.b32.xlu2 %v662_v12, %s1717_s26 }
 0x902   :  { %v665_v15 = vpop.permute.xlu2 %664 }
 0x903   :  { %v1933_v16 = vadd.f32 %v665_v15, %v657_v14 }
 0x905   :  { %v1527_v18 = vmul.f32 -2.0, %v1933_v16 }
 0x907   :  { %v670_v19 = vmul.f32 1.442695, %v1527_v18 }
 0x909   :  { %1633 = vpow2.f32 %v670_v19 }
 0x90f   :  { %v1634_v20 = vpop.eup %1633 }
 0x910   :  { %v672_v22 = vadd.f32 1.0, %v1634_v20  ;;  %v572_v23 = vpop.permute.xlu1 %571 }
 0x911   :  { %v1938_v17 = vadd.f32 %v572_v23, %v564_v21 }
 0x912   :  { %1635 = vrcp.f32 %v672_v22  ;;  %v684_v28 = vand.u32 2147483648, %v672_v22  ;;  %v682_v31 = vand.u32 2147483647, %v672_v22  ;;  %vm678_vm9 = vweird.f32 %v672_v22 }
 0x913   :  { %v1521_v24 = vmul.f32 -2.0, %v1938_v17 }
 0x914   :  { %v685_v36 = vor.u32 1.1754944e-38, %v684_v28  ;;  %vm683_vm12 = vcmp.eq.f32.partialorder %v682_v31, 8.507059e+37 }
 0x915   :  { %v577_v25 = vmul.f32 1.442695, %v1521_v24 }
 0x917   :  { %1637 = vpow2.f32 %v577_v25 }
 0x918   :  { %v1636_v41 = vpop.eup %1635 }
 0x919   :  { %v674_v26 = vmul.f32 %v1636_v41, %v672_v22  ;;  %vm679_vm8 = vweird.f32 %v1636_v41 }
 0x91a   :  { %vm680_vm11 = vmor %vm678_vm9, %vm679_vm8 }
 0x91b   :  { %v675_v27 = vsub.f32 1.0, %v674_v26 }
 0x91d   :  { %v1638_v29 = vpop.eup %1637  ;;  %v676_v30 = vmul.f32 %v1636_v41, %v675_v27 }
 0x91e   :  { %v579_v32 = vadd.f32 1.0, %v1638_v29 }
 0x91f   :  { %v677_v34 = vadd.f32 %v1636_v41, %v676_v30 }
 0x920   :  { %1639 = vrcp.f32 %v579_v32  ;;  %v591_v46 = vand.u32 2147483648, %v579_v32  ;;  %v589_v50 = vand.u32 2147483647, %v579_v32  ;;  %vm585_vm14 = vweird.f32 %v579_v32 }
 0x921   :  { %v681_v35 = vsel %vm680_vm11, %v1636_v41, %v677_v34 }
 0x922   :  { %v686_v37 = vsel %vm683_vm12, %v685_v36, %v681_v35  ;;  %v592_v49 = vor.u32 1.1754944e-38, %v591_v46  ;;  %vm590_vm0 = vcmp.eq.f32.partialorder %v589_v50, 8.507059e+37 }
 0x923   :  { %v688_v40 = vmul.f32 2.0, %v686_v37 }
 0x925   :  { %v1528_v42 = vadd.f32 -1.0, %v688_v40 }
 0x926   :  { %v1640_v43 = vpop.eup %1639 }
 0x927   :  { %691 = vrot.lane.b32.xlu1 %v1528_v42, %s1716_s25  ;;  %v581_v44 = vmul.f32 %v1640_v43, %v579_v32  ;;  %vm586_vm13 = vweird.f32 %v1640_v43 }
 0x928   :  { %vm587_vm15 = vmor %vm585_vm14, %vm586_vm13 }
 0x929   :  { %v582_v45 = vsub.f32 1.0, %v581_v44 }
 0x92b   :  { %v583_v47 = vmul.f32 %v1640_v43, %v582_v45 }
 0x92d   :  { %v584_v48 = vadd.f32 %v1640_v43, %v583_v47 }
 0x92f   :  { %v588_v51 = vsel %vm587_vm15, %v1640_v43, %v584_v48 }
 0x930   :  { %v593_v52 = vsel %vm590_vm0, %v592_v49, %v588_v51 }
 0x931   :  { %v595_v53 = vmul.f32 2.0, %v593_v52 }
 0x933   :  { %v1522_v56 = vadd.f32 -1.0, %v595_v53 }
 0x935   :  { %598 = vrot.lane.b32.xlu0 %v1522_v56, %s1716_s25 }
 0x999   :  { %v692_v63 = vpop.permute.xlu1 %691 }
 0x99a   :  { %v694_v0 = vmul.f32 %v692_v63, %v1919_v54 }
 0x99c   :  { %v695_v2 = vpack.c.bf16 %v694_v0, %v694_v0 }
 0x99e   :  { %697 = vrot.lane.b32.xlu0 %v695_v2, %s1717_s26 }
 0x9a7   :  { %v599_v4 = vpop.permute.xlu0 %598 }
 0x9a8   :  { %v601_v38 = vmul.f32 %v599_v4, %v1923_v5  ;;  %v90_v5 = vpop.f32.mrf.mxu0 }
 0x9a9   :  { %v91_v15 = vadd.f32 %v1770_v13, %v90_v5 }
 0x9aa   :  { %v602_v6 = vpack.c.bf16 %v601_v38, %v601_v38 }
 0x9ac   :  { %604 = vrot.lane.b32.xlu2 %v602_v6, %s1717_s26 }
 0x9b0   :  { %v1970_v9 = vpop.f32.mrf.mxu0 }
 0x9b8   :  { %v1972_v10 = vpop.f32.mrf.mxu0 }
 0x9c0   :  { %v1974_v12 = vpop.f32.mrf.mxu0 }
 0xa06   :  { %v605_v8 = vpop.permute.xlu2 %604 }
 0xa07   :  { %1523 = vmatmul.msk.bf16.vlgmr.msra.gmra.mxu3 %vm102_vm10, %v605_v8 }
 0xa08   :  { %972 = vmatpush.bf16.msra.mxu3 %v1742_v3 }
 0xa0c   :  { %973 = vmatpush.bf16.msra.mxu3 %v1757_v11 }
 0xa10   :  { %v698_v54 = vpop.permute.xlu0 %697 }
 0xa11   :  { %1529 = vmatmul.msk.bf16.vlgmr.msrb.gmra.mxu2 %vm102_vm10, %v698_v54  ;;  %1535 = vmatmul.msk.bf16.vlgmr.msrb.gmra.mxu0 %vm102_vm10, %v698_v54 }
 0xa12   :  { %1144 = vmatpush.bf16.msrb.mxu2 %v1742_v3  ;;  %1303 = vmatpush.bf16.msrb.mxu0 %v1849_v33 }
 0xa16   :  { %1145 = vmatpush.bf16.msrb.mxu2 %v1757_v11  ;;  %1304 = vmatpush.bf16.msrb.mxu0 %v1861_v39 }
 0xa8a   :  { %v618_v14 = vpop.f32.mrf.mxu3 }
 0xa8b   :  { %v619_v33 = vadd.f32 %v1812_v7, %v618_v14 }
 0xa8e   :  { %v803_v18 = vpop.f32.mrf.mxu0 }
 0xa8f   :  { %v807_v19 = vadd.f32 %v803_v18, %v91_v15 }
 0xa91   :  { %v1536_v20 = vmul.f32 -1.442695, %v807_v19 }
 0xa92   :  { %v620_v21 = vpop.f32.mrf.mxu3 }
 0xa93   :  { %1641 = vpow2.f32 %v1536_v20 }
 0xa94   :  { %v711_v22 = vpop.f32.mrf.mxu2 }
 0xa95   :  { %v712_v23 = vadd.f32 %v711_v22, %v619_v33 }
 0xa96   :  { %v805_v39 = vpop.f32.mrf.mxu0 }
 0xa97   :  { %v1530_v24 = vmul.f32 -1.442695, %v712_v23 }
 0xa99   :  { %v1642_v25 = vpop.eup %1641  ;;  %1643 = vpow2.f32 %v1530_v24 }
 0xa9a   :  { %v811_v41 = vadd.f32 1.0, %v1642_v25 }
 0xa9c   :  { %1645 = vrcp.f32 %v811_v41  ;;  %v713_v26 = vpop.f32.mrf.mxu2  ;;  %v823_v31 = vand.u32 2147483648, %v811_v41  ;;  %v821_v7 = vand.u32 2147483647, %v811_v41  ;;  %vm817_vm2 = vweird.f32 %v811_v41 }
 0xa9e   :  { %v824_v37 = vor.u32 1.1754944e-38, %v823_v31  ;;  %vm822_vm4 = vcmp.eq.f32.partialorder %v821_v7, 8.507059e+37 }
 0xa9f   :  { %v1644_v27 = vpop.eup %1643 }
 0xaa0   :  { %v718_v28 = vadd.f32 1.0, %v1644_v27 }
 0xaa2   :  { %v1646_v29 = vpop.eup %1645  ;;  %1647 = vrcp.f32 %v718_v28  ;;  %v730_v44 = vand.u32 2147483648, %v718_v28  ;;  %v728_v47 = vand.u32 2147483647, %v718_v28  ;;  %vm724_vm6 = vweird.f32 %v718_v28 }
 0xaa3   :  { %v813_v13 = vmul.f32 %v1646_v29, %v811_v41  ;;  %vm818_vm1 = vweird.f32 %v1646_v29 }
 0xaa4   :  { %vm819_vm3 = vmor %vm817_vm2, %vm818_vm1  ;;  %v731_v49 = vor.u32 1.1754944e-38, %v730_v44  ;;  %vm729_vm8 = vcmp.eq.f32.partialorder %v728_v47, 8.507059e+37 }
 0xaa5   :  { %v814_v30 = vsub.f32 1.0, %v813_v13 }
 0xaa7   :  { %v815_v32 = vmul.f32 %v1646_v29, %v814_v30 }
 0xaa8   :  { %v1648_v34 = vpop.eup %1647 }
 0xaa9   :  { %v720_v36 = vmul.f32 %v1648_v34, %v718_v28  ;;  %v816_v35 = vadd.f32 %v1646_v29, %v815_v32  ;;  %vm725_vm5 = vweird.f32 %v1648_v34 }
 0xaaa   :  { %vm726_vm7 = vmor %vm724_vm6, %vm725_vm5 }
 0xaab   :  { %v721_v40 = vsub.f32 1.0, %v720_v36  ;;  %v820_v42 = vsel %vm819_vm3, %v1646_v29, %v816_v35 }
 0xaac   :  { %v1978_v43 = vsel %vm822_vm4, %v824_v37, %v820_v42 }
 0xaad   :  { %v827_v45 = vmul.f32 2.0, %v1978_v43  ;;  %v722_v46 = vmul.f32 %v1648_v34, %v721_v40  ;;  %v829_v62 = vmul.f32 %v1978_v43, %v1933_v16 }
 0xaaf   :  { %v1537_v50 = vadd.f32 -1.0, %v827_v45  ;;  %v723_v48 = vadd.f32 %v1648_v34, %v722_v46 }
 0xab1   :  { %831 = vrot.lane.b32.xlu2 %v1537_v50, %s1716_s25  ;;  %v727_v51 = vsel %vm726_vm7, %v1648_v34, %v723_v48 }
 0xab2   :  { %v1982_v52 = vsel %vm729_vm8, %v731_v49, %v727_v51  ;;  %v2016_v51 = vld [vmem:[%s2148_s1 + $0x89] ss:$0 sm:$0xff] }
 0xab3   :  { %v734_v53 = vmul.f32 2.0, %v1982_v52  ;;  %v736_v16 = vmul.f32 %v1982_v52, %v1938_v17 }
 0xab5   :  { %v1531_v56 = vadd.f32 -1.0, %v734_v53 }
 0xab7   :  { %738 = vrot.lane.b32.xlu1 %v1531_v56, %s1716_s25 }
 0xb0b   :  { %v832_v57 = vpop.permute.xlu2 %831 }
 0xb0c   :  { %v834_v55 = vmul.f32 %v832_v57, %v1978_v43 }
 0xb0e   :  { %836 = vrot.lane.b32.xlu1 %v834_v55, %s1717_s26  ;;  %v2022_v55 = vld [vmem:[%s2148_s1 + $0x88] ss:$0 sm:$0xff] }
 0xb29   :  { %v739_v59 = vpop.permute.xlu1 %738 }
 0xb2a   :  { %v741_v61 = vmul.f32 %v739_v59, %v1982_v52  ;;  %v93_v59 = vadd.f32 %v2022_v55, %v1970_v9 }
 0xb2c   :  { %743 = vrot.lane.b32.xlu0 %v741_v61, %s1717_s26 }
 0xb80   :  { %v837_v63 = vpop.permute.xlu1 %836 }
 0xb81   :  { %v1992_v0 = vadd.f32 %v837_v63, %v829_v62 }
 0xb83   :  { %v1538_v1 = vmul.f32 -2.0, %v1992_v0 }
 0xb85   :  { %v842_v2 = vmul.f32 1.442695, %v1538_v1 }
 0xb87   :  { %1649 = vpow2.f32 %v842_v2 }
 0xb8d   :  { %v1650_v4 = vpop.eup %1649 }
 0xb8e   :  { %v844_v38 = vadd.f32 1.0, %v1650_v4 }
 0xb90   :  { %1651 = vrcp.f32 %v844_v38  ;;  %v856_v5 = vand.u32 2147483648, %v844_v38  ;;  %v854_v15 = vand.u32 2147483647, %v844_v38  ;;  %vm850_vm11 = vweird.f32 %v844_v38 }
 0xb92   :  { %v857_v20 = vor.u32 1.1754944e-38, %v856_v5  ;;  %vm855_vm13 = vcmp.eq.f32.partialorder %v854_v15, 8.507059e+37 }
 0xb96   :  { %v1652_v6 = vpop.eup %1651 }
 0xb97   :  { %v846_v8 = vmul.f32 %v1652_v6, %v844_v38  ;;  %vm851_vm9 = vweird.f32 %v1652_v6 }
 0xb98   :  { %vm852_vm12 = vmor %vm850_vm11, %vm851_vm9 }
 0xb99   :  { %v847_v54 = vsub.f32 1.0, %v846_v8 }
 0xb9b   :  { %v848_v14 = vmul.f32 %v1652_v6, %v847_v54 }
 0xb9d   :  { %v849_v18 = vadd.f32 %v1652_v6, %v848_v14 }
 0xb9e   :  { %v744_v19 = vpop.permute.xlu0 %743 }
 0xb9f   :  { %v1997_v21 = vadd.f32 %v744_v19, %v736_v16  ;;  %v853_v33 = vsel %vm852_vm12, %v1652_v6, %v849_v18 }
 0xba0   :  { %v858_v22 = vsel %vm855_vm13, %v857_v20, %v853_v33 }
 0xba1   :  { %v1532_v23 = vmul.f32 -2.0, %v1997_v21  ;;  %v860_v39 = vmul.f32 2.0, %v858_v22 }
 0xba3   :  { %v749_v24 = vmul.f32 1.442695, %v1532_v23  ;;  %v1539_v25 = vadd.f32 -1.0, %v860_v39 }
 0xba5   :  { %1653 = vpow2.f32 %v749_v24  ;;  %863 = vrot.lane.b32.xlu0 %v1539_v25, %s1716_s25 }
 0xbab   :  { %v1654_v41 = vpop.eup %1653 }
 0xbac   :  { %v751_v17 = vadd.f32 1.0, %v1654_v41 }
 0xbae   :  { %1655 = vrcp.f32 %v751_v17  ;;  %v763_v29 = vand.u32 2147483648, %v751_v17  ;;  %v761_v30 = vand.u32 2147483647, %v751_v17  ;;  %vm757_vm15 = vweird.f32 %v751_v17 }
 0xbb0   :  { %v764_v32 = vor.u32 1.1754944e-38, %v763_v29  ;;  %vm762_vm1 = vcmp.eq.f32.partialorder %v761_v30, 8.507059e+37 }
 0xbb4   :  { %v1656_v26 = vpop.eup %1655 }
 0xbb5   :  { %v753_v27 = vmul.f32 %v1656_v26, %v751_v17  ;;  %vm758_vm14 = vweird.f32 %v1656_v26 }
 0xbb6   :  { %vm759_vm0 = vmor %vm757_vm15, %vm758_vm14 }
 0xbb7   :  { %v754_v28 = vsub.f32 1.0, %v753_v27 }
 0xbb9   :  { %v755_v13 = vmul.f32 %v1656_v26, %v754_v28 }
 0xbbb   :  { %v756_v31 = vadd.f32 %v1656_v26, %v755_v13 }
 0xbbd   :  { %v760_v7 = vsel %vm759_vm0, %v1656_v26, %v756_v31 }
 0xbbe   :  { %v765_v34 = vsel %vm762_vm1, %v764_v32, %v760_v7 }
 0xbbf   :  { %v767_v36 = vmul.f32 2.0, %v765_v34 }
 0xbc1   :  { %v1533_v35 = vadd.f32 -1.0, %v767_v36 }
 0xbc3   :  { %770 = vrot.lane.b32.xlu2 %v1533_v35, %s1716_s25 }
 0xc17   :  { %v864_v37 = vpop.permute.xlu0 %863 }
 0xc18   :  { %v866_v40 = vmul.f32 %v864_v37, %v1978_v43 }
 0xc1a   :  { %v867_v42 = vpack.c.bf16 %v866_v40, %v866_v40 }
 0xc1c   :  { %869 = vrot.lane.b32.xlu2 %v867_v42, %s1717_s26 }
 0xc1d   :  { %v771_v44 = vpop.permute.xlu2 %770 }
 0xc1e   :  { %v773_v45 = vmul.f32 %v771_v44, %v1982_v52 }
 0xc20   :  { %v774_v46 = vpack.c.bf16 %v773_v45, %v773_v45 }
 0xc22   :  { %776 = vrot.lane.b32.xlu1 %v774_v46, %s1717_s26 }
 0xc76   :  { %v870_v47 = vpop.permute.xlu2 %869 }
 0xc77   :  { %1540 = vmatmul.msk.bf16.vlgmr.msra.gmra.mxu1 %vm102_vm10, %v870_v47 }
 0xc78   :  { %1316 = vmatpush.bf16.msra.mxu1 %v1742_v3 }
 0xc7c   :  { %1317 = vmatpush.bf16.msra.mxu1 %v1757_v11 }
 0xc94   :  { %v777_v50 = vpop.permute.xlu1 %776 }
 0xc95   :  { %1534 = vmatmul.msk.bf16.vlgmr.msrb.gmra.mxu3 %vm102_vm10, %v777_v50 }
 0xc96   :  { %1224 = vmatpush.bf16.msrb.mxu3 %v1788_v58 }
 0xc9a   :  { %1225 = vmatpush.bf16.msrb.mxu3 %v1794_v60 }
 0xca5   :  { %1546 = vmatmul.msk.bf16.vlgmr.msra.gmra.mxu3 %vm102_vm10, %v870_v47 }
 0xcf4   :  { %v883_v43 = vpop.f32.mrf.mxu1 }
 0xcfc   :  { %v885_v48 = vpop.f32.mrf.mxu1 }
 0xd18   :  { %v790_v49 = vpop.f32.mrf.mxu3 }
 0xd19   :  { %v791_v3 = vadd.f32 %v2016_v51, %v790_v49 }
 0xd1b   :  { %v884_v11 = vadd.f32 %v883_v43, %v791_v3 }
 0xd1d   :  { %v1541_v52 = vmul.f32 -1.442695, %v884_v11 }
 0xd1f   :  { %1657 = vpow2.f32 %v1541_v52 }
 0xd20   :  { %v792_v53 = vpop.f32.mrf.mxu3 }
 0xd25   :  { %v1658_v56 = vpop.eup %1657 }
 0xd26   :  { %v890_v57 = vadd.f32 1.0, %v1658_v56 }
 0xd28   :  { %1659 = vrcp.f32 %v890_v57  ;;  %v975_v61 = vpop.f32.mrf.mxu3  ;;  %v902_v6 = vand.u32 2147483648, %v890_v57  ;;  %v900_v5 = vand.u32 2147483647, %v890_v57  ;;  %vm896_vm3 = vweird.f32 %v890_v57 }
 0xd29   :  { %v979_v62 = vadd.f32 %v975_v61, %v93_v59 }
 0xd2a   :  { %v903_v9 = vor.u32 1.1754944e-38, %v902_v6  ;;  %vm901_vm5 = vcmp.eq.f32.partialorder %v900_v5, 8.507059e+37 }
 0xd2b   :  { %v1547_v63 = vmul.f32 -1.442695, %v979_v62 }
 0xd2d   :  { %1661 = vpow2.f32 %v1547_v63 }
 0xd2e   :  { %v1660_v1 = vpop.eup %1659 }
 0xd2f   :  { %v892_v2 = vmul.f32 %v1660_v1, %v890_v57  ;;  %vm897_vm2 = vweird.f32 %v1660_v1 }
 0xd30   :  { %v977_v4 = vpop.f32.mrf.mxu3  ;;  %vm898_vm4 = vmor %vm896_vm3, %vm897_vm2 }
 0xd31   :  { %v893_v38 = vsub.f32 1.0, %v892_v2 }
 0xd33   :  { %v1662_v8 = vpop.eup %1661  ;;  %v894_v54 = vmul.f32 %v1660_v1, %v893_v38 }
 0xd34   :  { %v983_v14 = vadd.f32 1.0, %v1662_v8 }
 0xd35   :  { %v895_v15 = vadd.f32 %v1660_v1, %v894_v54 }
 0xd36   :  { %1663 = vrcp.f32 %v983_v14  ;;  %v995_v39 = vand.u32 2147483648, %v983_v14  ;;  %v993_v25 = vand.u32 2147483647, %v983_v14  ;;  %vm989_vm7 = vweird.f32 %v983_v14 }
 0xd37   :  { %v899_v16 = vsel %vm898_vm4, %v1660_v1, %v895_v15 }
 0xd38   :  { %v2026_v18 = vsel %vm901_vm5, %v903_v9, %v899_v16  ;;  %v996_v17 = vor.u32 1.1754944e-38, %v995_v39  ;;  %vm994_vm9 = vcmp.eq.f32.partialorder %v993_v25, 8.507059e+37 }
 0xd39   :  { %v906_v19 = vmul.f32 2.0, %v2026_v18  ;;  %v908_v7 = vmul.f32 %v2026_v18, %v1997_v21 }
 0xd3b   :  { %v1542_v20 = vadd.f32 -1.0, %v906_v19 }
 0xd3c   :  { %v1664_v33 = vpop.eup %1663 }
 0xd3d   :  { %v985_v22 = vmul.f32 %v1664_v33, %v983_v14  ;;  %910 = vrot.lane.b32.xlu0 %v1542_v20, %s1716_s25  ;;  %vm990_vm6 = vweird.f32 %v1664_v33 }
 0xd3e   :  { %vm991_vm8 = vmor %vm989_vm7, %vm990_vm6 }
 0xd3f   :  { %v986_v23 = vsub.f32 1.0, %v985_v22 }
 0xd41   :  { %v987_v24 = vmul.f32 %v1664_v33, %v986_v23 }
 0xd43   :  { %v988_v41 = vadd.f32 %v1664_v33, %v987_v24 }
 0xd45   :  { %v992_v26 = vsel %vm991_vm8, %v1664_v33, %v988_v41 }
 0xd46   :  { %v2030_v27 = vsel %vm994_vm9, %v996_v17, %v992_v26 }
 0xd47   :  { %v999_v28 = vmul.f32 2.0, %v2030_v27  ;;  %v1001_v53 = vmul.f32 %v2030_v27, %v1992_v0 }
 0xd49   :  { %v1548_v29 = vadd.f32 -1.0, %v999_v28  ;;  %v96_v28 = vadd.f32 %v2022_v55, %v1972_v10 }
 0xd4b   :  { %1003 = vrot.lane.b32.xlu1 %v1548_v29, %s1716_s25 }
 0xdaf   :  { %v911_v13 = vpop.permute.xlu0 %910 }
 0xdb0   :  { %v913_v30 = vmul.f32 %v911_v13, %v2026_v18 }
 0xdb2   :  { %915 = vrot.lane.b32.xlu2 %v913_v30, %s1717_s26 }
 0xdbd   :  { %v1004_v31 = vpop.permute.xlu1 %1003 }
 0xdbe   :  { %v1006_v32 = vmul.f32 %v1004_v31, %v2030_v27 }
 0xdc0   :  { %1008 = vrot.lane.b32.xlu0 %v1006_v32, %s1717_s26 }
 0xe0c   :  { %v916_v34 = vpop.permute.xlu2 %915 }
 0xe0d   :  { %v2040_v36 = vadd.f32 %v916_v34, %v908_v7 }
 0xe0f   :  { %v1543_v35 = vmul.f32 -2.0, %v2040_v36 }
 0xe11   :  { %v921_v37 = vmul.f32 1.442695, %v1543_v35 }
 0xe13   :  { %1665 = vpow2.f32 %v921_v37 }
 0xe19   :  { %v1666_v40 = vpop.eup %1665 }
 0xe1a   :  { %v923_v42 = vadd.f32 1.0, %v1666_v40 }
 0xe1c   :  { %1667 = vrcp.f32 %v923_v42  ;;  %v935_v47 = vand.u32 2147483648, %v923_v42  ;;  %v933_v43 = vand.u32 2147483647, %v923_v42  ;;  %vm929_vm12 = vweird.f32 %v923_v42 }
 0xe1e   :  { %v936_v21 = vor.u32 1.1754944e-38, %v935_v47  ;;  %vm934_vm14 = vcmp.eq.f32.partialorder %v933_v43, 8.507059e+37 }
 0xe22   :  { %v1668_v44 = vpop.eup %1667 }
 0xe23   :  { %v925_v45 = vmul.f32 %v1668_v44, %v923_v42  ;;  %vm930_vm11 = vweird.f32 %v1668_v44 }
 0xe24   :  { %vm931_vm13 = vmor %vm929_vm12, %vm930_vm11 }
 0xe25   :  { %v926_v46 = vsub.f32 1.0, %v925_v45 }
 0xe27   :  { %v927_v50 = vmul.f32 %v1668_v44, %v926_v46 }
 0xe29   :  { %v928_v48 = vadd.f32 %v1668_v44, %v927_v50 }
 0xe2b   :  { %v932_v49 = vsel %vm931_vm13, %v1668_v44, %v928_v48 }
 0xe2c   :  { %v937_v3 = vsel %vm934_vm14, %v936_v21, %v932_v49 }
 0xe2d   :  { %v939_v11 = vmul.f32 2.0, %v937_v3 }
 0xe2f   :  { %v1544_v52 = vadd.f32 -1.0, %v939_v11 }
 0xe31   :  { %942 = vrot.lane.b32.xlu1 %v1544_v52, %s1716_s25 }
 0xe32   :  { %v1009_v56 = vpop.permute.xlu0 %1008 }
 0xe33   :  { %v2046_v57 = vadd.f32 %v1009_v56, %v1001_v53 }
 0xe35   :  { %v1549_v59 = vmul.f32 -2.0, %v2046_v57 }
 0xe37   :  { %v1014_v61 = vmul.f32 1.442695, %v1549_v59 }
 0xe39   :  { %1669 = vpow2.f32 %v1014_v61 }
 0xe3f   :  { %v1670_v62 = vpop.eup %1669 }
 0xe40   :  { %v1016_v63 = vadd.f32 1.0, %v1670_v62 }
 0xe42   :  { %1671 = vrcp.f32 %v1016_v63  ;;  %v1028_v38 = vand.u32 2147483648, %v1016_v63  ;;  %v1026_v8 = vand.u32 2147483647, %v1016_v63  ;;  %vm1022_vm0 = vweird.f32 %v1016_v63 }
 0xe44   :  { %v1029_v0 = vor.u32 1.1754944e-38, %v1028_v38  ;;  %vm1027_vm2 = vcmp.eq.f32.partialorder %v1026_v8, 8.507059e+37 }
 0xe48   :  { %v1672_v1 = vpop.eup %1671 }
 0xe49   :  { %v1018_v2 = vmul.f32 %v1672_v1, %v1016_v63  ;;  %vm1023_vm15 = vweird.f32 %v1672_v1 }
 0xe4a   :  { %vm1024_vm1 = vmor %vm1022_vm0, %vm1023_vm15 }
 0xe4b   :  { %v1019_v4 = vsub.f32 1.0, %v1018_v2 }
 0xe4d   :  { %v1020_v6 = vmul.f32 %v1672_v1, %v1019_v4 }
 0xe4f   :  { %v1021_v54 = vadd.f32 %v1672_v1, %v1020_v6 }
 0xe51   :  { %v1025_v5 = vsel %vm1024_vm1, %v1672_v1, %v1021_v54 }
 0xe52   :  { %v1030_v14 = vsel %vm1027_vm2, %v1029_v0, %v1025_v5 }
 0xe53   :  { %v1032_v15 = vmul.f32 2.0, %v1030_v14 }
 0xe55   :  { %v1550_v9 = vadd.f32 -1.0, %v1032_v15 }
 0xe57   :  { %1035 = vrot.lane.b32.xlu2 %v1550_v9, %s1716_s25 }
 0xea3   :  { %v943_v16 = vpop.permute.xlu1 %942 }
 0xea4   :  { %v945_v19 = vmul.f32 %v943_v16, %v2026_v18 }
 0xea6   :  { %v946_v20 = vpack.c.bf16 %v945_v19, %v945_v19 }
 0xea8   :  { %948 = vrot.lane.b32.xlu0 %v946_v20, %s1717_s26 }
 0xeb1   :  { %v1036_v33 = vpop.permute.xlu2 %1035 }
 0xeb2   :  { %v1038_v22 = vmul.f32 %v1036_v33, %v2030_v27 }
 0xeb4   :  { %v1039_v23 = vpack.c.bf16 %v1038_v22, %v1038_v22 }
 0xeb6   :  { %1041 = vrot.lane.b32.xlu1 %v1039_v23, %s1717_s26 }
 0xf1a   :  { %v949_v39 = vpop.permute.xlu0 %948 }
 0xf1b   :  { %1545 = vmatmul.msk.bf16.vlgmr.msra.gmra.mxu2 %vm102_vm10, %v949_v39 }
 0xf1c   :  { %1396 = vmatpush.bf16.msra.mxu2 %v1788_v58 }
 0xf20   :  { %1397 = vmatpush.bf16.msra.mxu2 %v1794_v60 }
 0xf28   :  { %v1042_v24 = vpop.permute.xlu1 %1041 }
 0xf29   :  { %1551 = vmatmul.msk.bf16.vlgmr.msra.gmra.mxu0 %vm102_vm10, %v1042_v24 }
 0xf2b   :  { %1557 = vmatmul.msk.bf16.vlgmr.msrb.gmra.mxu2 %vm102_vm10, %v1042_v24 }
 0xf9e   :  { %v962_v18 = vpop.f32.mrf.mxu2 }
 0xf9f   :  { %v963_v25 = vadd.f32 %v2016_v51, %v962_v18 }
 0xfa6   :  { %v964_v41 = vpop.f32.mrf.mxu2  ;;  %v1055_v17 = vpop.f32.mrf.mxu0 }
 0xfa7   :  { %v1056_v26 = vadd.f32 %v1055_v17, %v963_v25 }
 0xfa9   :  { %v1552_v27 = vmul.f32 -1.442695, %v1056_v26 }
 0xfab   :  { %1673 = vpow2.f32 %v1552_v27 }
 0xfae   :  { %v1057_v29 = vpop.f32.mrf.mxu0  ;;  %v1147_v58 = vpop.f32.mrf.mxu2 }
 0xfaf   :  { %v1151_v13 = vadd.f32 %v1147_v58, %v96_v28 }
 0xfb1   :  { %v1674_v60 = vpop.eup %1673  ;;  %v1558_v30 = vmul.f32 -1.442695, %v1151_v13 }
 0xfb2   :  { %v1062_v31 = vadd.f32 1.0, %v1674_v60 }
 0xfb3   :  { %1675 = vpow2.f32 %v1558_v30 }
 0xfb4   :  { %1677 = vrcp.f32 %v1062_v31  ;;  %v1074_v42 = vand.u32 2147483648, %v1062_v31  ;;  %v1072_v45 = vand.u32 2147483647, %v1062_v31  ;;  %vm1068_vm4 = vweird.f32 %v1062_v31 }
 0xfb6   :  { %v1149_v32 = vpop.f32.mrf.mxu2  ;;  %v1075_v47 = vor.u32 1.1754944e-38, %v1074_v42  ;;  %vm1073_vm6 = vcmp.eq.f32.partialorder %v1072_v45, 8.507059e+37 }
 0xfb9   :  { %v1676_v7 = vpop.eup %1675 }
 0xfba   :  { %v1678_v34 = vpop.eup %1677  ;;  %v1155_v35 = vadd.f32 1.0, %v1676_v7 }
 0xfbb   :  { %v1064_v37 = vmul.f32 %v1678_v34, %v1062_v31  ;;  %vm1069_vm3 = vweird.f32 %v1678_v34 }
 0xfbc   :  { %1679 = vrcp.f32 %v1155_v35  ;;  %vm1070_vm5 = vmor %vm1068_vm4, %vm1069_vm3  ;;  %v1167_v3 = vand.u32 2147483648, %v1155_v35  ;;  %v1165_v53 = vand.u32 2147483647, %v1155_v35  ;;  %vm1161_vm8 = vweird.f32 %v1155_v35 }
 0xfbd   :  { %v1065_v40 = vsub.f32 1.0, %v1064_v37 }
 0xfbe   :  { %v1168_v59 = vor.u32 1.1754944e-38, %v1167_v3  ;;  %vm1166_vm11 = vcmp.eq.f32.partialorder %v1165_v53, 8.507059e+37 }
 0xfbf   :  { %v1066_v44 = vmul.f32 %v1678_v34, %v1065_v40 }
 0xfc1   :  { %v1067_v10 = vadd.f32 %v1678_v34, %v1066_v44 }
 0xfc2   :  { %v1680_v46 = vpop.eup %1679 }
 0xfc3   :  { %v1157_v50 = vmul.f32 %v1680_v46, %v1155_v35  ;;  %v1071_v43 = vsel %vm1070_vm5, %v1678_v34, %v1067_v10  ;;  %vm1162_vm7 = vweird.f32 %v1680_v46 }
 0xfc4   :  { %v2062_v48 = vsel %vm1073_vm6, %v1075_v47, %v1071_v43  ;;  %vm1163_vm9 = vmor %vm1161_vm8, %vm1162_vm7 }
 0xfc5   :  { %v1158_v21 = vsub.f32 1.0, %v1157_v50  ;;  %v1078_v49 = vmul.f32 2.0, %v2062_v48  ;;  %v1080_v8 = vmul.f32 %v2062_v48, %v2040_v36 }
 0xfc7   :  { %v1553_v11 = vadd.f32 -1.0, %v1078_v49  ;;  %v1159_v52 = vmul.f32 %v1680_v46, %v1158_v21 }
 0xfc9   :  { %1082 = vrot.lane.b32.xlu2 %v1553_v11, %s1716_s25  ;;  %v1160_v56 = vadd.f32 %v1680_v46, %v1159_v52 }
 0xfcb   :  { %v1164_v61 = vsel %vm1163_vm9, %v1680_v46, %v1160_v56 }
 0xfcc   :  { %v2066_v62 = vsel %vm1166_vm11, %v1168_v59, %v1164_v61 }
 0xfcd   :  { %v1171_v63 = vmul.f32 2.0, %v2066_v62  ;;  %v1173_v15 = vmul.f32 %v2066_v62, %v2046_v57 }
 0xfcf   :  { %v1559_v1 = vadd.f32 -1.0, %v1171_v63 }
 0xfd1   :  { %1175 = vrot.lane.b32.xlu0 %v1559_v1, %s1716_s25 }
0x1023   :  { %v1083_v2 = vpop.permute.xlu2 %1082 }
0x1024   :  { %v1085_v4 = vmul.f32 %v1083_v2, %v2062_v48 }
0x1026   :  { %1087 = vrot.lane.b32.xlu1 %v1085_v4, %s1717_s26 }
0x1043   :  { %v1176_v38 = vpop.permute.xlu0 %1175 }
0x1044   :  { %v1178_v6 = vmul.f32 %v1176_v38, %v2066_v62 }
0x1046   :  { %1180 = vrot.lane.b32.xlu2 %v1178_v6, %s1717_s26 }
0x1098   :  { %v1088_v54 = vpop.permute.xlu1 %1087 }
0x1099   :  { %v2076_v0 = vadd.f32 %v1088_v54, %v1080_v8 }
0x109b   :  { %v1554_v5 = vmul.f32 -2.0, %v2076_v0 }
0x109d   :  { %v1093_v14 = vmul.f32 1.442695, %v1554_v5 }
0x109f   :  { %1681 = vpow2.f32 %v1093_v14 }
0x10a0   :  { %v1181_v9 = vpop.permute.xlu2 %1180 }
0x10a1   :  { %v2081_v16 = vadd.f32 %v1181_v9, %v1173_v15 }
0x10a3   :  { %v1560_v19 = vmul.f32 -2.0, %v2081_v16 }
0x10a5   :  { %v1682_v20 = vpop.eup %1681  ;;  %v1186_v33 = vmul.f32 1.442695, %v1560_v19 }
0x10a6   :  { %v1095_v22 = vadd.f32 1.0, %v1682_v20 }
0x10a7   :  { %1683 = vpow2.f32 %v1186_v33 }
0x10a8   :  { %1685 = vrcp.f32 %v1095_v22  ;;  %v1107_v25 = vand.u32 2147483648, %v1095_v22  ;;  %v1105_v57 = vand.u32 2147483647, %v1095_v22  ;;  %vm1101_vm13 = vweird.f32 %v1095_v22 }
0x10aa   :  { %v1108_v27 = vor.u32 1.1754944e-38, %v1107_v25  ;;  %vm1106_vm15 = vcmp.eq.f32.partialorder %v1105_v57, 8.507059e+37 }
0x10ad   :  { %v1684_v36 = vpop.eup %1683 }
0x10ae   :  { %v1686_v23 = vpop.eup %1685  ;;  %v1188_v39 = vadd.f32 1.0, %v1684_v36 }
0x10af   :  { %v1097_v24 = vmul.f32 %v1686_v23, %v1095_v22  ;;  %vm1102_vm12 = vweird.f32 %v1686_v23 }
0x10b0   :  { %1687 = vrcp.f32 %v1188_v39  ;;  %vm1103_vm14 = vmor %vm1101_vm13, %vm1102_vm12  ;;  %v1200_v30 = vand.u32 2147483648, %v1188_v39  ;;  %v1198_v7 = vand.u32 2147483647, %v1188_v39  ;;  %vm1194_vm1 = vweird.f32 %v1188_v39 }
0x10b1   :  { %v1098_v18 = vsub.f32 1.0, %v1097_v24 }
0x10b2   :  { %v1201_v35 = vor.u32 1.1754944e-38, %v1200_v30  ;;  %vm1199_vm3 = vcmp.eq.f32.partialorder %v1198_v7, 8.507059e+37 }
0x10b3   :  { %v1099_v41 = vmul.f32 %v1686_v23, %v1098_v18 }
0x10b5   :  { %v1100_v17 = vadd.f32 %v1686_v23, %v1099_v41 }
0x10b6   :  { %v1688_v26 = vpop.eup %1687 }
0x10b7   :  { %v1104_v28 = vsel %vm1103_vm14, %v1686_v23, %v1100_v17  ;;  %v1190_v29 = vmul.f32 %v1688_v26, %v1188_v39  ;;  %vm1195_vm0 = vweird.f32 %v1688_v26 }
0x10b8   :  { %v1109_v58 = vsel %vm1106_vm15, %v1108_v27, %v1104_v28  ;;  %vm1196_vm2 = vmor %vm1194_vm1, %vm1195_vm0 }
0x10b9   :  { %v1111_v13 = vmul.f32 2.0, %v1109_v58  ;;  %v1191_v60 = vsub.f32 1.0, %v1190_v29 }
0x10bb   :  { %v1555_v31 = vadd.f32 -1.0, %v1111_v13  ;;  %v1192_v32 = vmul.f32 %v1688_v26, %v1191_v60 }
0x10bd   :  { %1114 = vrot.lane.b32.xlu0 %v1555_v31, %s1716_s25  ;;  %v1193_v34 = vadd.f32 %v1688_v26, %v1192_v32 }
0x10bf   :  { %v1197_v37 = vsel %vm1196_vm2, %v1688_v26, %v1193_v34 }
0x10c0   :  { %v1202_v40 = vsel %vm1199_vm3, %v1201_v35, %v1197_v37 }
0x10c1   :  { %v1204_v42 = vmul.f32 2.0, %v1202_v40 }
0x10c3   :  { %v1561_v44 = vadd.f32 -1.0, %v1204_v42 }
0x10c5   :  { %1207 = vrot.lane.b32.xlu1 %v1561_v44, %s1716_s25 }
0x112f   :  { %v1115_v45 = vpop.permute.xlu0 %1114 }
0x1130   :  { %v1117_v10 = vmul.f32 %v1115_v45, %v2062_v48  ;;  %v98_v48 = vadd.f32 %v2022_v55, %v1974_v12 }
0x1132   :  { %v1118_v46 = vpack.c.bf16 %v1117_v10, %v1117_v10 }
0x1134   :  { %1120 = vrot.lane.b32.xlu2 %v1118_v46, %s1717_s26 }
0x1137   :  { %v1208_v47 = vpop.permute.xlu1 %1207 }
0x1138   :  { %v1210_v50 = vmul.f32 %v1208_v47, %v2066_v62 }
0x113a   :  { %v1211_v43 = vpack.c.bf16 %v1210_v50, %v1210_v50 }
0x113c   :  { %1213 = vrot.lane.b32.xlu0 %v1211_v43, %s1717_s26 }
0x118e   :  { %v1121_v21 = vpop.permute.xlu2 %1120 }
0x118f   :  { %1556 = vmatmul.msk.bf16.vlgmr.msrb.gmra.mxu1 %vm102_vm10, %v1121_v21 }
0x11ae   :  { %v1214_v49 = vpop.permute.xlu0 %1213 }
0x11af   :  { %1562 = vmatmul.msk.bf16.vlgmr.msrb.gmra.mxu3 %vm102_vm10, %v1214_v49  ;;  %1568 = vmatmul.msk.bf16.vlgmr.msra.gmra.mxu1 %vm102_vm10, %v1214_v49 }
0x120c   :  { %v1134_v3 = vpop.f32.mrf.mxu1 }
0x120d   :  { %v1135_v59 = vadd.f32 %v2016_v51, %v1134_v3 }
0x1214   :  { %v1136_v11 = vpop.f32.mrf.mxu1 }
0x122c   :  { %v1319_v52 = vpop.f32.mrf.mxu1 }
0x122d   :  { %v1323_v53 = vadd.f32 %v1319_v52, %v98_v48 }
0x122f   :  { %v1569_v56 = vmul.f32 -1.442695, %v1323_v53 }
0x1231   :  { %1689 = vpow2.f32 %v1569_v56 }
0x1232   :  { %v1227_v61 = vpop.f32.mrf.mxu3 }
0x1233   :  { %v1228_v62 = vadd.f32 %v1227_v61, %v1135_v59 }
0x1234   :  { %v1321_v63 = vpop.f32.mrf.mxu1 }
0x1235   :  { %v1563_v1 = vmul.f32 -1.442695, %v1228_v62 }
0x1237   :  { %v1690_v2 = vpop.eup %1689  ;;  %1691 = vpow2.f32 %v1563_v1 }
0x1238   :  { %v1327_v4 = vadd.f32 1.0, %v1690_v2 }
0x123a   :  { %1693 = vrcp.f32 %v1327_v4  ;;  %v1229_v38 = vpop.f32.mrf.mxu3  ;;  %v1339_v5 = vand.u32 2147483648, %v1327_v4  ;;  %v1337_v15 = vand.u32 2147483647, %v1327_v4  ;;  %vm1333_vm5 = vweird.f32 %v1327_v4 }
0x123c   :  { %v1340_v33 = vor.u32 1.1754944e-38, %v1339_v5  ;;  %vm1338_vm7 = vcmp.eq.f32.partialorder %v1337_v15, 8.507059e+37 }
0x123d   :  { %v1692_v6 = vpop.eup %1691 }
0x123e   :  { %v1234_v8 = vadd.f32 1.0, %v1692_v6 }
0x1240   :  { %v1694_v54 = vpop.eup %1693  ;;  %1695 = vrcp.f32 %v1234_v8  ;;  %v1246_v39 = vand.u32 2147483648, %v1234_v8  ;;  %v1244_v25 = vand.u32 2147483647, %v1234_v8  ;;  %vm1240_vm9 = vweird.f32 %v1234_v8 }
0x1241   :  { %v1329_v12 = vmul.f32 %v1694_v54, %v1327_v4  ;;  %vm1334_vm4 = vweird.f32 %v1694_v54 }
0x1242   :  { %vm1335_vm6 = vmor %vm1333_vm5, %vm1334_vm4  ;;  %v1247_v17 = vor.u32 1.1754944e-38, %v1246_v39  ;;  %vm1245_vm12 = vcmp.eq.f32.partialorder %v1244_v25, 8.507059e+37 }
0x1243   :  { %v1330_v55 = vsub.f32 1.0, %v1329_v12 }
0x1245   :  { %v1331_v14 = vmul.f32 %v1694_v54, %v1330_v55 }
0x1246   :  { %v1696_v9 = vpop.eup %1695 }
0x1247   :  { %v1236_v19 = vmul.f32 %v1696_v9, %v1234_v8  ;;  %v1332_v20 = vadd.f32 %v1694_v54, %v1331_v14  ;;  %vm1241_vm8 = vweird.f32 %v1696_v9 }
0x1248   :  { %vm1242_vm11 = vmor %vm1240_vm9, %vm1241_vm8 }
0x1249   :  { %v1237_v22 = vsub.f32 1.0, %v1236_v19  ;;  %v1336_v36 = vsel %vm1335_vm6, %v1694_v54, %v1332_v20 }
0x124a   :  { %v2096_v23 = vsel %vm1338_vm7, %v1340_v33, %v1336_v36 }
0x124b   :  { %v1343_v24 = vmul.f32 2.0, %v2096_v23  ;;  %v1238_v18 = vmul.f32 %v1696_v9, %v1237_v22  ;;  %v1345_v42 = vmul.f32 %v2096_v23, %v2081_v16 }
0x124d   :  { %v1570_v41 = vadd.f32 -1.0, %v1343_v24  ;;  %v1239_v57 = vadd.f32 %v1696_v9, %v1238_v18 }
0x124f   :  { %1347 = vrot.lane.b32.xlu1 %v1570_v41, %s1716_s25  ;;  %v1243_v26 = vsel %vm1242_vm11, %v1696_v9, %v1239_v57 }
0x1250   :  { %v2100_v27 = vsel %vm1245_vm12, %v1247_v17, %v1243_v26 }
0x1251   :  { %v1250_v28 = vmul.f32 2.0, %v2100_v27  ;;  %v1252_v31 = vmul.f32 %v2100_v27, %v2076_v0 }
0x1253   :  { %v1564_v29 = vadd.f32 -1.0, %v1250_v28 }
0x1255   :  { %1254 = vrot.lane.b32.xlu2 %v1564_v29, %s1716_s25 }
0x12af   :  { %v1255_v58 = vpop.permute.xlu2 %1254 }
0x12b0   :  { %v1257_v13 = vmul.f32 %v1255_v58, %v2100_v27 }
0x12b2   :  { %1259 = vrot.lane.b32.xlu1 %v1257_v13, %s1717_s26 }
0x12c1   :  { %v1348_v60 = vpop.permute.xlu1 %1347 }
0x12c2   :  { %v1350_v30 = vmul.f32 %v1348_v60, %v2096_v23 }
0x12c4   :  { %1352 = vrot.lane.b32.xlu0 %v1350_v30, %s1717_s26 }
0x1324   :  { %v1260_v32 = vpop.permute.xlu1 %1259 }
0x1325   :  { %v2110_v7 = vadd.f32 %v1260_v32, %v1252_v31 }
0x1327   :  { %v1565_v34 = vmul.f32 -2.0, %v2110_v7 }
0x1329   :  { %v1265_v35 = vmul.f32 1.442695, %v1565_v34 }
0x132b   :  { %1697 = vpow2.f32 %v1265_v35 }
0x1331   :  { %v1698_v37 = vpop.eup %1697 }
0x1332   :  { %v1267_v40 = vadd.f32 1.0, %v1698_v37 }
0x1334   :  { %1699 = vrcp.f32 %v1267_v40  ;;  %v1279_v43 = vand.u32 2147483648, %v1267_v40  ;;  %v1277_v49 = vand.u32 2147483647, %v1267_v40  ;;  %vm1273_vm14 = vweird.f32 %v1267_v40 }
0x1336   :  { %v1353_v44 = vpop.permute.xlu0 %1352  ;;  %v1280_v11 = vor.u32 1.1754944e-38, %v1279_v43  ;;  %vm1278_vm0 = vcmp.eq.f32.partialorder %v1277_v49, 8.507059e+37 }
0x1337   :  { %v1355_v45 = vadd.f32 %v1353_v44, %v1345_v42 }
0x1339   :  { %v1571_v10 = vmul.f32 -2.0, %v1355_v45 }
0x133a   :  { %v1700_v46 = vpop.eup %1699 }
0x133b   :  { %v1358_v47 = vmul.f32 1.442695, %v1571_v10  ;;  %v1269_v50 = vmul.f32 %v1700_v46, %v1267_v40  ;;  %vm1274_vm13 = vweird.f32 %v1700_v46 }
0x133c   :  { %vm1275_vm15 = vmor %vm1273_vm14, %vm1274_vm13 }
0x133d   :  { %1701 = vpow2.f32 %v1358_v47  ;;  %v1270_v0 = vsub.f32 1.0, %v1269_v50 }
0x133f   :  { %v1271_v21 = vmul.f32 %v1700_v46, %v1270_v0 }
0x1341   :  { %v1272_v3 = vadd.f32 %v1700_v46, %v1271_v21 }
0x1343   :  { %v1702_v48 = vpop.eup %1701  ;;  %v1276_v52 = vsel %vm1275_vm15, %v1700_v46, %v1272_v3 }
0x1344   :  { %v1360_v16 = vadd.f32 1.0, %v1702_v48  ;;  %v1281_v53 = vsel %vm1278_vm0, %v1280_v11, %v1276_v52 }
0x1345   :  { %v1283_v56 = vmul.f32 2.0, %v1281_v53 }
0x1346   :  { %1703 = vrcp.f32 %v1360_v16  ;;  %v1372_v1 = vand.u32 2147483648, %v1360_v16  ;;  %v1370_v4 = vand.u32 2147483647, %v1360_v16  ;;  %vm1366_vm2 = vweird.f32 %v1360_v16 }
0x1347   :  { %v1566_v59 = vadd.f32 -1.0, %v1283_v56  ;;  %v34_v56 = vld [vmem:[%s2148_s1 + $0x78] sm:$0xff] }
0x1348   :  { %v1373_v6 = vor.u32 1.1754944e-38, %v1372_v1  ;;  %vm1371_vm4 = vcmp.eq.f32.partialorder %v1370_v4, 8.507059e+37 }
0x1349   :  { %1286 = vrot.lane.b32.xlu0 %v1566_v59, %s1716_s25  ;;  %v35_v59 = vld [vmem:[%s2148_s1 + $0x80] sm:$0xff] }
0x134c   :  { %v1704_v61 = vpop.eup %1703 }
0x134d   :  { %v1362_v62 = vmul.f32 %v1704_v61, %v1360_v16  ;;  %vm1367_vm1 = vweird.f32 %v1704_v61 }
0x134e   :  { %vm1368_vm3 = vmor %vm1366_vm2, %vm1367_vm1 }
0x134f   :  { %v1363_v63 = vsub.f32 1.0, %v1362_v62  ;;  %v37_v62 = vpack.c.bf16 %v35_v59, %v34_v56 }
0x1351   :  { %v1364_v2 = vmul.f32 %v1704_v61, %v1363_v63  ;;  %v33_v63 = vld [vmem:[%s2148_s1 + $0x70] sm:$0xff]  ;;  %1476 = vmatpush.bf16.msra.mxu3 %v37_v62 }
0x1353   :  { %v1365_v38 = vadd.f32 %v1704_v61, %v1364_v2 }
0x1355   :  { %v1369_v8 = vsel %vm1368_vm3, %v1704_v61, %v1365_v38  ;;  %v32_v61 = vld [vmem:[%s2148_s1 + $0x68] sm:$0xff] }
0x1356   :  { %v1374_v54 = vsel %vm1371_vm4, %v1373_v6, %v1369_v8  ;;  %v36_v1 = vpack.c.bf16 %v33_v63, %v32_v61  ;;  %v1584_v8 = vld [vmem:[%s2148_s1 + $0x8a] ss:$0 sm:$0xff] }
0x1357   :  { %v1376_v12 = vmul.f32 2.0, %v1374_v54 }
0x1358   :  { %1477 = vmatpush.bf16.msra.mxu3 %v36_v1 }
0x1359   :  { %v1572_v55 = vadd.f32 -1.0, %v1376_v12 }
0x135b   :  { %1379 = vrot.lane.b32.xlu2 %v1572_v55, %s1716_s25 }
0x13b5   :  { %v1380_v5 = vpop.permute.xlu2 %1379 }
0x13b6   :  { %v1382_v14 = vmul.f32 %v1380_v5, %v2096_v23 }
0x13b8   :  { %v1383_v15 = vpack.c.bf16 %v1382_v14, %v1382_v14 }
0x13ba   :  { %1385 = vrot.lane.b32.xlu1 %v1383_v15, %s1717_s26 }
0x13bb   :  { %v1287_v9 = vpop.permute.xlu0 %1286 }
0x13bc   :  { %v1289_v19 = vmul.f32 %v1287_v9, %v2100_v27 }
0x13be   :  { %v1290_v20 = vpack.c.bf16 %v1289_v19, %v1289_v19 }
0x13c0   :  { %1292 = vrot.lane.b32.xlu2 %v1290_v20, %s1717_s26 }
0x141a   :  { %v1293_v33 = vpop.permute.xlu2 %1292 }
0x141b   :  { %1567 = vmatmul.msk.bf16.vlgmr.msrb.gmra.mxu0 %vm102_vm10, %v1293_v33 }
0x142c   :  { %v1386_v22 = vpop.permute.xlu1 %1385 }
0x142d   :  { %1573 = vmatmul.msk.bf16.vlgmr.msra.gmra.mxu2 %vm102_vm10, %v1386_v22 }
0x1498   :  { %v1306_v36 = vpop.f32.mrf.mxu0 }
0x1499   :  { %v1307_v24 = vadd.f32 %v2016_v51, %v1306_v36 }
0x14a0   :  { %v1308_v39 = vpop.f32.mrf.mxu0 }
0x14b0   :  { %v1399_v23 = vpop.f32.mrf.mxu2 }
0x14b1   :  { %v1400_v18 = vadd.f32 %v1399_v23, %v1307_v24 }
0x14b3   :  { %v1574_v25 = vmul.f32 -1.442695, %v1400_v18 }
0x14b5   :  { %1705 = vpow2.f32 %v1574_v25 }
0x14b8   :  { %v1401_v41 = vpop.f32.mrf.mxu2 }
0x14bb   :  { %v1706_v57 = vpop.eup %1705 }
0x14bc   :  { %v1406_v17 = vadd.f32 1.0, %v1706_v57 }
0x14be   :  { %1707 = vrcp.f32 %v1406_v17  ;;  %v1418_v29 = vand.u32 2147483648, %v1406_v17  ;;  %v1416_v13 = vand.u32 2147483647, %v1406_v17  ;;  %vm1412_vm6 = vweird.f32 %v1406_v17 }
0x14c0   :  { %v1419_v30 = vor.u32 1.1754944e-38, %v1418_v29  ;;  %vm1417_vm8 = vcmp.eq.f32.partialorder %v1416_v13, 8.507059e+37 }
0x14c4   :  { %v1708_v26 = vpop.eup %1707 }
0x14c5   :  { %v1408_v27 = vmul.f32 %v1708_v26, %v1406_v17  ;;  %vm1413_vm5 = vweird.f32 %v1708_v26 }
0x14c6   :  { %vm1414_vm7 = vmor %vm1412_vm6, %vm1413_vm5 }
0x14c7   :  { %v1409_v28 = vsub.f32 1.0, %v1408_v27 }
0x14c9   :  { %v1410_v58 = vmul.f32 %v1708_v26, %v1409_v28 }
0x14cb   :  { %v1411_v60 = vadd.f32 %v1708_v26, %v1410_v58 }
0x14cd   :  { %v1415_v51 = vsel %vm1414_vm7, %v1708_v26, %v1411_v60 }
0x14ce   :  { %v1420_v31 = vsel %vm1417_vm8, %v1419_v30, %v1415_v51 }
0x14cf   :  { %v1422_v32 = vmul.f32 2.0, %v1420_v31  ;;  %v1424_v40 = vmul.f32 %v1420_v31, %v2110_v7 }
0x14d1   :  { %v1575_v34 = vadd.f32 -1.0, %v1422_v32 }
0x14d3   :  { %1426 = vrot.lane.b32.xlu0 %v1575_v34, %s1716_s25 }
0x1545   :  { %v1427_v35 = vpop.permute.xlu0 %1426 }
0x1546   :  { %v1429_v37 = vmul.f32 %v1427_v35, %v1420_v31 }
0x1548   :  { %1431 = vrot.lane.b32.xlu1 %v1429_v37, %s1717_s26 }
0x15ba   :  { %v1432_v42 = vpop.permute.xlu1 %1431 }
0x15bb   :  { %v1434_v44 = vadd.f32 %v1432_v42, %v1424_v40 }
0x15bd   :  { %v1576_v45 = vmul.f32 -2.0, %v1434_v44 }
0x15bf   :  { %v1437_v10 = vmul.f32 1.442695, %v1576_v45 }
0x15c1   :  { %1709 = vpow2.f32 %v1437_v10 }
0x15c7   :  { %v1710_v46 = vpop.eup %1709 }
0x15c8   :  { %v1439_v47 = vadd.f32 1.0, %v1710_v46 }
0x15ca   :  { %1711 = vrcp.f32 %v1439_v47  ;;  %v1451_v21 = vand.u32 2147483648, %v1439_v47  ;;  %v1449_v3 = vand.u32 2147483647, %v1439_v47  ;;  %vm1445_vm11 = vweird.f32 %v1439_v47 }
0x15cc   :  { %v1452_v48 = vor.u32 1.1754944e-38, %v1451_v21  ;;  %vm1450_vm13 = vcmp.eq.f32.partialorder %v1449_v3, 8.507059e+37 }
0x15d0   :  { %v1712_v50 = vpop.eup %1711 }
0x15d1   :  { %v1441_v0 = vmul.f32 %v1712_v50, %v1439_v47  ;;  %vm1446_vm9 = vweird.f32 %v1712_v50 }
0x15d2   :  { %vm1447_vm12 = vmor %vm1445_vm11, %vm1446_vm9 }
0x15d3   :  { %v1442_v43 = vsub.f32 1.0, %v1441_v0 }
0x15d5   :  { %v1443_v49 = vmul.f32 %v1712_v50, %v1442_v43 }
0x15d7   :  { %v1444_v11 = vadd.f32 %v1712_v50, %v1443_v49 }
0x15d9   :  { %v1448_v7 = vsel %vm1447_vm12, %v1712_v50, %v1444_v11 }
0x15da   :  { %v1453_v52 = vsel %vm1450_vm13, %v1452_v48, %v1448_v7 }
0x15db   :  { %v1455_v16 = vmul.f32 2.0, %v1453_v52 }
0x15dd   :  { %v1577_v53 = vadd.f32 -1.0, %v1455_v16 }
0x15df   :  { %1458 = vrot.lane.b32.xlu2 %v1577_v53, %s1716_s25 }
0x1639   :  { %v1459_v2 = vpop.permute.xlu2 %1458 }
0x163a   :  { %v1461_v4 = vmul.f32 %v1459_v2, %v1420_v31 }
0x163c   :  { %v1462_v38 = vpack.c.bf16 %v1461_v4, %v1461_v4 }
0x163e   :  { %1465 = vrot.lane.b32.xlu0 %v1462_v38, %s1717_s26 }
0x16b0   :  { %v1466_v6 = vpop.permute.xlu0 %1465 }
0x16b1   :  { %1578 = vmatmul.msk.bf16.vlgmr.msra.gmra.mxu3 %vm102_vm10, %v1466_v6 }
0x1734   :  { %v1479_v54 = vpop.f32.mrf.mxu3 }
0x1735   :  { %v1480_v12 = vadd.f32 %v1584_v8, %v1479_v54 }
0x1737   :  { %1483 = vst [vmem:[%s2150_s2] sm:$0xff] %v1480_v12 }
0x173c   :  { %v1481_v55 = vpop.f32.mrf.mxu3 }

</bundles_post_ra>
